<compile_context>
chip_gen: v5e
topology: v5e:2x2
jax: 0.10.0
libtpu: 0.0.40
codegen_flags: <defaults>
</compile_context>

<pallas_src>
import functools

import jax
import jax.numpy as jnp
import numpy as np
from jax.experimental import pallas as pl
from jax.experimental.pallas import tpu as pltpu


_NEG_BIG = -1e30  # bias padding for padded vocab columns (kills softmax mass)


def _round_up(x, m):
    return ((x + m - 1) // m) * m


def _vmem_limit_bytes():
    """Per-generation scoped-VMEM limit with headroom for compiler scratch."""
    cap = 128 * 1024 * 1024
    try:
        info = pltpu.get_tpu_info()
        cap = int(getattr(info, "vmem_capacity_bytes", cap))
    except Exception:
        pass
    # v5e/v6e (128 MiB) -> 96 MiB, v7x (64 MiB) -> 48 MiB.
    return int(max(32 * 1024 * 1024, min((cap * 3) // 4, 112 * 1024 * 1024)))


def _pick_batch_block(batch, requested=None):
    for cand in (requested, 8, 4, 2, 1):
        if cand and cand <= batch and batch % cand == 0:
            return cand
    return 1


# ----------------------------------------------------------------------------
# Fused MLM-head (H -> V) + CITADEL router post-processing + tok/cls project.
#   grid = (B/TB, pass, vocab_tile); logits never hit HBM.
# ----------------------------------------------------------------------------
def _fused_router_kernel(*refs, topk, tv, seq, tb, hdim, cache_logits, add_cls):
    it = iter(refs)
    mask_ref = next(it)      # (TB, S, 1)  f32  attention mask, CLS row zeroed
    hidden_ref = next(it)    # (TB, S, H)  bf16
    wv_ref = next(it)        # (H, TV)     bf16
    bv_ref = next(it)        # (1, TV)     f32
    wtok_ref = next(it)      # (H, P)      bf16 (VMEM resident)
    btok_ref = next(it)      # (1, P)      f32
    if add_cls:
        wcls_ref = next(it)  # (H, Pc)     bf16 (VMEM resident)
        bcls_ref = next(it)  # (1, Pc)     f32
    rr_ref = next(it)        # (TB, 1, TV) f32  router_repr tile
    rm_ref = next(it)        # (TB, 1, TV) f32  router_mask (summed over seq)
    sm_ref = next(it)        # (TB, 1, TV) f32  router_softmax (summed over seq)
    ew_ref = next(it)        # (TB, S, K)  f32  expert weights
    eid_ref = next(it)       # (TB, S, K)  i32  expert ids
    tok_ref = next(it)       # (TB, S, P)  f32  tok projection (masked)
    if add_cls:
        cls_ref = next(it)   # (TB, 1, Pc) f32
    cand_v = next(it)        # VMEM (TB*S, K) f32  running top-k values
    cand_i = next(it)        # VMEM (TB*S, K) i32  running top-k global ids
    m_run = next(it)         # VMEM (TB*S, 1) f32  online softmax running max
    l_run = next(it)         # VMEM (TB*S, 1) f32  online softmax denominator
    cache_ref = next(it) if cache_logits else None  # VMEM (NV, TB*S, TV) f32

    p = pl.program_id(1)          # 0: build running state, 1: emit outputs
    t = pl.program_id(2)          # vocab tile index
    nv = pl.num_programs(2)
    rows = tb * seq

    row_mask = mask_ref[...].reshape(rows, 1)                       # (rows, 1)
    lane = jax.lax.broadcasted_iota(jnp.int32, (1, tv), 1)
    base = t * tv
    int_max = jnp.int32(2 ** 31 - 1)

    def _hidden2():
        return hidden_ref[...].reshape(rows, hdim)

    def _compute_logits():
        return (
            jnp.dot(_hidden2(), wv_ref[...], preferred_element_type=jnp.float32)
            + bv_ref[...]
        )                                                            # (rows, tv)

    if cache_logits:
        @pl.when(p == 0)
        def _fill_cache():
            cache_ref[t] = _compute_logits()

        logits = cache_ref[t]          # pass 0: read-back; pass 1: cached tile
    else:
        logits = _compute_logits()     # pass 1 recomputes on the MXU

    # ------------------------------- pass 0 ---------------------------------
    @pl.when(p == 0)
    def _pass0():
        @pl.when(t == 0)
        def _init():
            cand_v[...] = jnp.full((rows, topk), -jnp.inf, dtype=jnp.float32)
            cand_i[...] = jnp.zeros((rows, topk), dtype=jnp.int32)
            m_run[...] = jnp.full((rows, 1), -jnp.inf, dtype=jnp.float32)
            l_run[...] = jnp.zeros((rows, 1), dtype=jnp.float32)

        # Online softmax denominator over the vocab axis.
        m_old = m_run[...]
        m_new = jnp.maximum(m_old, jnp.max(logits, axis=1, keepdims=True))
        l_run[...] = l_run[...] * jnp.exp(m_old - m_new) + jnp.sum(
            jnp.exp(logits - m_new), axis=1, keepdims=True)
        m_run[...] = m_new

        # full_router_repr tile = log(1 + relu(logits)) * mask (CLS/pad -> 0).
        frr = jnp.log1p(jnp.maximum(logits, 0.0)) * row_mask         # (rows, tv)

        # router_repr tile: max over the sequence, emitted already in pass 0.
        rr_ref[...] = jnp.max(frr.reshape(tb, seq, tv), axis=1, keepdims=True)

        # Tile-local top-k on the lane-aligned (rows, tv) frr ...
        work = frr
        loc_v, loc_i = [], []
        for _ in range(topk):
            best = jnp.max(work, axis=1, keepdims=True)               # (rows, 1)
            sel = jnp.min(jnp.where(work >= best, lane, int_max),
                          axis=1, keepdims=True)                      # lowest id
            loc_v.append(best)
            loc_i.append(sel + base)
            work = jnp.where(lane == sel, -jnp.inf, work)

        # ... then merge against the running candidates in a tiny (rows, 2K)
        # pool (no (rows, K+TV) concatenation).
        pool_v = jnp.concatenate([cand_v[...]] + loc_v, axis=1)       # (rows, 2K)
        pool_i = jnp.concatenate([cand_i[...]] + loc_i, axis=1)
        new_v, new_i = [], []
        for _ in range(topk):
            best = jnp.max(pool_v, axis=1, keepdims=True)
            sel = jnp.min(jnp.where(pool_v >= best, pool_i, int_max),
                          axis=1, keepdims=True)
            new_v.append(best)
            new_i.append(sel)
            pool_v = jnp.where(pool_i == sel, -jnp.inf, pool_v)
        cand_v[...] = jnp.concatenate(new_v, axis=1)
        cand_i[...] = jnp.concatenate(new_i, axis=1)

    # ------------------------------- pass 1 ---------------------------------
    @pl.when(p == 1)
    def _pass1():
        not_cls = (jax.lax.broadcasted_iota(jnp.int32, (tb, seq, 1), 1) > 0
                   ).astype(jnp.float32)

        # Softmax over vocab, summed over the non-CLS sequence rows.
        # (pl.reciprocal(approx=True) would move the divide to the EUP but its
        #  ~2^-12 relative error does not pass the 1e-4 reference check.)
        probs = jnp.exp(logits - m_run[...]) * (1.0 / l_run[...])     # (rows, tv)
        sm_ref[...] = jnp.sum(probs.reshape(tb, seq, tv) * not_cls,
                              axis=1, keepdims=True)

        # router_mask tile: membership of the final top-k ids in this tile,
        # gated by weight > 0 (which also excludes CLS / padded rows).
        cv = cand_v[...]
        ci = cand_i[...]
        hits = jnp.zeros((rows, tv), jnp.float32)
        for k in range(topk):
            local = ci[:, k:k + 1] - base                             # (rows, 1)
            gate = jnp.logical_and(
                cv[:, k:k + 1] > 0.0,
                jnp.logical_and(local >= 0, local < tv))
            hits = hits + jnp.where(jnp.logical_and(lane == local, gate),
                                    1.0, 0.0)
        rm_ref[...] = jnp.sum(hits.reshape(tb, seq, tv), axis=1, keepdims=True)

        # Per-batch-block results emitted once (fused tok / cls projections).
        @pl.when(t == nv - 1)
        def _emit():
            ew_ref[...] = cv.reshape(tb, seq, topk)
            eid_ref[...] = ci.reshape(tb, seq, topk)
            h_all = hidden_ref[...]                                   # (tb, S, H)
            hid2 = h_all.reshape(rows, hdim)
            pdim = wtok_ref.shape[1]
            tokp = (jnp.dot(hid2, wtok_ref[...],
                            preferred_element_type=jnp.float32)
                    + btok_ref[...]) * row_mask
            tok_ref[...] = tokp.reshape(tb, seq, pdim)
            if add_cls:
                pc = wcls_ref.shape[1]
                cls_h = h_all[:, 0, :]                                # (tb, H)
                cls = (jnp.dot(cls_h, wcls_ref[...],
                               preferred_element_type=jnp.float32)
                       + bcls_ref[...])
                cls_ref[...] = cls.reshape(tb, 1, pc)


def _fused_router(hidden_bf16, row_mask_3d, w_vocab_p, b_vocab_p, w_tok, b_tok,
                  w_cls, b_cls, *, topk, tv, tb, cache_logits, add_cls,
                  vmem_limit):
    B, S, H = hidden_bf16.shape
    Vp = w_vocab_p.shape[1]
    nv = Vp // tv
    P = w_tok.shape[1]
    grid = (B // tb, 2, nv)

    kernel = functools.partial(
        _fused_router_kernel, topk=topk, tv=tv, seq=S, tb=tb, hdim=H,
        cache_logits=cache_logits, add_cls=add_cls)

    # W_vocab / b_vocab tiles stream only in pass 0 when the logits are cached
    # (pass 1 stays pinned on the already-resident last tile -> no re-DMA).
    if cache_logits:
        wv_map = lambda b, p, t: (0, t * (1 - p) + (nv - 1) * p)
    else:
        wv_map = lambda b, p, t: (0, t)

    in_specs = [
        pl.BlockSpec((tb, S, 1), lambda b, p, t: (b, 0, 0)),   # CLS-zeroed mask
        pl.BlockSpec((tb, S, H), lambda b, p, t: (b, 0, 0)),   # hidden block
        pl.BlockSpec((H, tv), wv_map),                         # W_vocab tile
        pl.BlockSpec((1, tv), wv_map),                         # b_vocab tile
        pl.BlockSpec((H, P), lambda b, p, t: (0, 0)),          # W_tok (resident)
        pl.BlockSpec((1, P), lambda b, p, t: (0, 0)),          # b_tok
    ]
    operands = [row_mask_3d, hidden_bf16, w_vocab_p, b_vocab_p, w_tok, b_tok]
    if add_cls:
        Pc = w_cls.shape[1]
        in_specs += [pl.BlockSpec((H, Pc), lambda b, p, t: (0, 0)),
                     pl.BlockSpec((1, Pc), lambda b, p, t: (0, 0))]
        operands += [w_cls, b_cls]

    # router_repr is written in pass 0 (block (b, t)); during pass 1 its index
    # stays pinned on the last-written block so nothing stale is flushed.
    rr_spec = pl.BlockSpec(
        (tb, 1, tv), lambda b, p, t: (b, 0, t * (1 - p) + (nv - 1) * p))
    # router_mask / router_softmax are written in pass 1 (block (b, t)); during
    # pass 0 their index stays pinned on block (b, 0), which pass 1 writes
    # first, so the uninitialized buffer is never flushed.
    p1_spec = pl.BlockSpec((tb, 1, tv), lambda b, p, t: (b, 0, p * t))
    seq_spec = lambda n: pl.BlockSpec((tb, S, n), lambda b, p, t: (b, 0, 0))

    out_specs = [rr_spec, p1_spec, p1_spec,
                 seq_spec(topk), seq_spec(topk), seq_spec(P)]
    out_shape = [
        jax.ShapeDtypeStruct((B, 1, Vp), jnp.float32),       # router_repr
        jax.ShapeDtypeStruct((B, 1, Vp), jnp.float32),       # router_mask sum
        jax.ShapeDtypeStruct((B, 1, Vp), jnp.float32),       # router_softmax sum
        jax.ShapeDtypeStruct((B, S, topk), jnp.float32),     # expert weights
        jax.ShapeDtypeStruct((B, S, topk), jnp.int32),       # expert ids
        jax.ShapeDtypeStruct((B, S, P), jnp.float32),        # tok projection
    ]
    if add_cls:
        Pc = w_cls.shape[1]
        out_specs.append(pl.BlockSpec((tb, 1, Pc), lambda b, p, t: (b, 0, 0)))
        out_shape.append(jax.ShapeDtypeStruct((B, 1, Pc), jnp.float32))

    scratch = [
        pltpu.VMEM((tb * S, topk), jnp.float32),   # running top-k values
        pltpu.VMEM((tb * S, topk), jnp.int32),     # running top-k ids
        pltpu.VMEM((tb * S, 1), jnp.float32),      # online softmax max
        pltpu.VMEM((tb * S, 1), jnp.float32),      # online softmax denom
    ]
    if cache_logits:
        scratch.append(pltpu.VMEM((nv, tb * S, tv), jnp.float32))

    mxu_passes = 1 if cache_logits else 2
    flops = 2 * B * S * H * Vp * mxu_passes + 2 * B * S * H * P
    bytes_accessed = (
        B * S * H * 2                                  # hidden, once per row
        + (B // tb) * mxu_passes * H * Vp * 2          # W_vocab streams
        + 3 * B * Vp * 4
        + B * S * (2 * topk + P) * 4)

    return pl.pallas_call(
        kernel,
        grid=grid,
        in_specs=in_specs,
        out_specs=tuple(out_specs),
        out_shape=tuple(out_shape),
        scratch_shapes=scratch,
        compiler_params=pltpu.CompilerParams(
            # batch blocks are independent -> megacore-shardable.
            dimension_semantics=("parallel", "arbitrary", "arbitrary"),
            vmem_limit_bytes=vmem_limit,
        ),
        cost_estimate=pl.CostEstimate(
            flops=flops,
            transcendentals=3 * B * S * Vp,
            bytes_accessed=bytes_accessed,
        ),
    )(*operands)


# ----------------------------------------------------------------------------
# Tiny kernel for the two scalar statistics derived from router_mask.
# ----------------------------------------------------------------------------
def _router_stats_kernel(rm_ref, cond_ref, marg_ref):
    rm = rm_ref[...]                                             # (B, V)
    row_sum = jnp.sum(rm, axis=1, keepdims=True)                 # (B, 1)
    cond_ref[...] = jnp.mean(row_sum, axis=0, keepdims=True)     # (1, 1)
    col_max = jnp.max(rm, axis=0, keepdims=True)                 # (1, V)
    marg_ref[...] = jnp.sum(col_max, axis=1, keepdims=True)      # (1, 1)


# ----------------------------------------------------------------------------
# CITADELEncoder.forward (post-transformer part), Pallas-backed.
# ----------------------------------------------------------------------------
def citadel_forward(hidden, attention_mask, params, topk=1, add_cls=False,
                    vocab_tile=512, batch_block=None, cache_logits=None):
    B, S, H = hidden.shape
    V = params["w_vocab"].shape[1]
    P = params["w_tok"].shape[1]

    hidden_bf16 = hidden.astype(jnp.bfloat16)

    # Vocab tile & padding: pad V up to a multiple of the tile instead of
    # falling back to one full-V block (which would blow VMEM for real vocabs).
    tv = max(128, (vocab_tile // 128) * 128)
    tv = min(tv, _round_up(V, 128))
    Vp = _round_up(V, tv)
    pad = Vp - V
    w_vocab = jnp.pad(params["w_vocab"], ((0, 0), (0, pad))).astype(jnp.bfloat16)
    b_vocab = jnp.pad(params["b_vocab"].astype(jnp.float32), (0, pad),
                      constant_values=_NEG_BIG).reshape(1, Vp)

    w_tok = params["w_tok"].astype(jnp.bfloat16)
    b_tok = params["b_tok"].astype(jnp.float32).reshape(1, P)
    w_cls = b_cls = None
    if add_cls:
        w_cls = params["w_cls"].astype(jnp.bfloat16)
        b_cls = params["b_cls"].astype(jnp.float32).reshape(1, -1)

    tb = _pick_batch_block(B, batch_block)
    vmem_limit = _vmem_limit_bytes()
    if cache_logits is None:
        # Cache the f32 logits in VMEM (kills the pass-1 MXU recompute and the
        # second W_vocab stream) only when it fits with ample headroom.
        cache_logits = (tb * S * Vp * 4) <= vmem_limit // 2
    cache_logits = bool(cache_logits)

    # Attention mask with the CLS position zeroed: applied inside the kernel
    # instead of slicing (B, S, *) activations in HBM.
    mask_f = attention_mask.astype(jnp.float32)
    router_row_mask = mask_f.at[:, 0].set(0.0)                   # (B, S)

    outs = _fused_router(
        hidden_bf16, router_row_mask[:, :, None], w_vocab, b_vocab,
        w_tok, b_tok, w_cls, b_cls,
        topk=topk, tv=tv, tb=tb, cache_logits=cache_logits,
        add_cls=add_cls, vmem_limit=vmem_limit)

    if add_cls:
        rr3, rm3, sm3, ew, eid, tok, cls3 = outs
    else:
        rr3, rm3, sm3, ew, eid, tok = outs

    router_repr = rr3[:, 0, :V]
    router_mask_sum = rm3[:, 0, :V]
    router_softmax_sum = sm3[:, 0, :V]

    avg_cond, avg_marg = pl.pallas_call(
        _router_stats_kernel,
        out_shape=(jax.ShapeDtypeStruct((1, 1), jnp.float32),
                   jax.ShapeDtypeStruct((1, 1), jnp.float32)),
    )(router_mask_sum)

    ret = {
        "avg_cond_num_experts": avg_cond,
        "avg_marg_num_experts": avg_marg,
        "router_mask": router_mask_sum,
        "router_softmax_repr": router_softmax_sum,
        "attention_mask": attention_mask[:, 1:],
        "router_repr": router_repr,
        "expert_ids": eid[:, 1:, :],
        "expert_repr": tok[:, 1:, :],
        "expert_weights": ew[:, 1:, :],
    }
    if add_cls:
        ret["cls_repr"] = cls3[:, 0, :]
    return ret


# ----------------------------------------------------------------------------
# Pure-JAX reference (identical bf16-operand / f32-accumulation matmul math).
# ----------------------------------------------------------------------------
def citadel_reference(hidden, attention_mask, params, topk=1, add_cls=False):
    hb = hidden.astype(jnp.bfloat16)
    logits = jnp.einsum(
        "bsh,hv->bsv", hb, params["w_vocab"].astype(jnp.bfloat16),
        preferred_element_type=jnp.float32) + params["b_vocab"]
    hiddens = hb[:, 1:, :]
    mask_i = attention_mask[:, 1:]
    mask = mask_i.astype(jnp.float32)
    lg = logits[:, 1:, :]
    frr = jnp.log1p(jax.nn.relu(lg)) * mask[:, :, None]
    router_repr = jnp.max(frr, axis=1)
    ew, eid = jax.lax.top_k(frr, topk)
    tokp = jnp.einsum(
        "bsh,hp->bsp", hiddens, params["w_tok"].astype(jnp.bfloat16),
        preferred_element_type=jnp.float32) + params["b_tok"]
    expert_repr = tokp * mask[:, :, None]
    onehot = jax.nn.one_hot(eid, frr.shape[-1], dtype=jnp.float32)
    router_mask = jnp.sum(onehot * (ew > 0.0)[..., None].astype(jnp.float32), axis=2)
    rm_sum = jnp.sum(router_mask, axis=1)
    ret = {
        "avg_cond_num_experts": jnp.mean(
            jnp.sum(rm_sum, axis=1, keepdims=True), axis=0, keepdims=True),
        "avg_marg_num_experts": jnp.sum(
            jnp.max(rm_sum, axis=0, keepdims=True), axis=1, keepdims=True),
        "router_mask": rm_sum,
        "router_softmax_repr": jnp.sum(jax.nn.softmax(lg, axis=-1), axis=1),
        "attention_mask": mask_i,
        "router_repr": router_repr,
        "expert_ids": eid.astype(jnp.int32),
        "expert_repr": expert_repr,
        "expert_weights": ew,
    }
    if add_cls:
        ret["cls_repr"] = jnp.einsum(
            "bh,hp->bp", hb[:, 0, :], params["w_cls"].astype(jnp.bfloat16),
            preferred_element_type=jnp.float32) + params["b_cls"]
    return ret


if __name__ == "__main__":
    # V is intentionally NOT a multiple of 128 so the vocab-padding path runs;
    # vocab_tile=128 -> 3 padded vocab tiles exercising the streaming top-k
    # merge and the cross-tile online softmax.
    B, S, H, V = 2, 8, 32, 300
    TOK_P, CLS_P, K = 16, 16, 2

    key = jax.random.PRNGKey(0)
    k1, k2, k3, k4, k5 = jax.random.split(key, 5)

    # "last hidden state" stand-in + attention mask (second sequence padded).
    hidden = jax.random.normal(k1, (B, S, H), jnp.float32)
    attention_mask = jnp.array([[1] * S, [1] * 5 + [0] * (S - 5)], dtype=jnp.int32)

    params = {
        "w_vocab": jax.random.normal(k2, (H, V), jnp.float32) * 0.125,
        "b_vocab": jax.random.normal(k5, (V,), jnp.float32) * 0.05,
        "w_tok": jax.random.normal(k3, (H, TOK_P), jnp.float32) * 0.02,
        "b_tok": jnp.zeros((TOK_P,), jnp.float32),
        "w_cls": jax.random.normal(k4, (H, CLS_P), jnp.float32) * 0.02,
        "b_cls": jnp.zeros((CLS_P,), jnp.float32),
    }

    ref = citadel_reference(hidden, attention_mask, params, topk=K, add_cls=True)

    # Exercise both the logits-cache (single MXU pass) and the recompute paths.
    for cache in (True, False):
        ret = citadel_forward(hidden, attention_mask, params, topk=K,
                              add_cls=True, vocab_tile=128, cache_logits=cache)
        ret = jax.tree_util.tree_map(jax.block_until_ready, ret)
        for name in ref:
            np.testing.assert_allclose(
                np.asarray(ret[name], dtype=np.float64),
                np.asarray(ref[name], dtype=np.float64),
                rtol=1e-4,
                atol=1e-4,
                err_msg=f"{name} (cache_logits={cache})",
            )

    print("KERNEL_OK")
</pallas_src>

<mosaic_0001>
module attributes {stable_mosaic.version = 11 : i64} {
  func.func @_fused_router_kernel(%arg0: i32, %arg1: i32, %arg2: i32, %arg3: memref<2x8x1xf32, #tpu.memory_space<vmem>>, %arg4: memref<2x8x32xbf16, #tpu.memory_space<vmem>>, %arg5: memref<32x128xbf16, #tpu.memory_space<vmem>>, %arg6: memref<1x128xf32, #tpu.memory_space<vmem>>, %arg7: memref<32x16xbf16, #tpu.memory_space<vmem>>, %arg8: memref<1x16xf32, #tpu.memory_space<vmem>>, %arg9: memref<32x16xbf16, #tpu.memory_space<vmem>>, %arg10: memref<1x16xf32, #tpu.memory_space<vmem>>, %arg11: memref<2x1x128xf32, #tpu.memory_space<vmem>>, %arg12: memref<2x1x128xf32, #tpu.memory_space<vmem>>, %arg13: memref<2x1x128xf32, #tpu.memory_space<vmem>>, %arg14: memref<2x8x2xf32, #tpu.memory_space<vmem>>, %arg15: memref<2x8x2xi32, #tpu.memory_space<vmem>>, %arg16: memref<2x8x16xf32, #tpu.memory_space<vmem>>, %arg17: memref<2x1x16xf32, #tpu.memory_space<vmem>>, %arg18: memref<16x2xf32, #tpu.memory_space<vmem>>, %arg19: memref<16x2xi32, #tpu.memory_space<vmem>>, %arg20: memref<16x1xf32, #tpu.memory_space<vmem>>, %arg21: memref<16x1xf32, #tpu.memory_space<vmem>>, %arg22: memref<3x16x128xf32, #tpu.memory_space<vmem>>) attributes {dimension_semantics = [#tpu.dimension_semantics<parallel>, #tpu.dimension_semantics<arbitrary>, #tpu.dimension_semantics<arbitrary>], iteration_bounds = array<i64: 1, 2, 3>, scalar_prefetch = 0 : i64, scratch_operands = 5 : i64, tpu.core_type = #tpu.core_type<tc>, window_params = [{transform_indices = @transform_0, window_bounds = array<i64: 2, 8, 1>}, {transform_indices = @transform_1, window_bounds = array<i64: 2, 8, 32>}, {transform_indices = @transform_2, window_bounds = array<i64: 32, 128>}, {transform_indices = @transform_3, window_bounds = array<i64: 1, 128>}, {pipeline_mode = #tpu.pipeline_mode<synchronous>, transform_indices = @transform_4, window_bounds = array<i64: 32, 16>}, {pipeline_mode = #tpu.pipeline_mode<synchronous>, transform_indices = @transform_5, window_bounds = array<i64: 1, 16>}, {pipeline_mode = #tpu.pipeline_mode<synchronous>, transform_indices = @transform_6, window_bounds = array<i64: 32, 16>}, {pipeline_mode = #tpu.pipeline_mode<synchronous>, transform_indices = @transform_7, window_bounds = array<i64: 1, 16>}, {transform_indices = @transform_8, window_bounds = array<i64: 2, 1, 128>}, {transform_indices = @transform_9, window_bounds = array<i64: 2, 1, 128>}, {transform_indices = @transform_10, window_bounds = array<i64: 2, 1, 128>}, {transform_indices = @transform_11, window_bounds = array<i64: 2, 8, 2>}, {transform_indices = @transform_12, window_bounds = array<i64: 2, 8, 2>}, {transform_indices = @transform_13, window_bounds = array<i64: 2, 8, 16>}, {transform_indices = @transform_14, window_bounds = array<i64: 2, 1, 16>}]} {
    %c0 = arith.constant 0 : index
    %c0_0 = arith.constant 0 : index
    %c0_1 = arith.constant 0 : index
    %0 = vector.load %arg3[%c0, %c0_0, %c0_1] : memref<2x8x1xf32, #tpu.memory_space<vmem>>, vector<2x8x1xf32>
    %1 = vector.shape_cast %0 : vector<2x8x1xf32> to vector<16x1xf32>
    %2 = tpu.iota {dimensions = array<i32: 1>} : vector<1x128xi32>
    %c128_i32 = arith.constant 128 : i32
    %3 = arith.muli %arg2, %c128_i32 : i32
    %c0_i32 = arith.constant 0 : i32
    %4 = arith.cmpi eq, %arg1, %c0_i32 : i32
    %5 = arith.extui %4 : i1 to i32
    %c0_i32_2 = arith.constant 0 : i32
    %6 = arith.cmpi ne, %5, %c0_i32_2 : i32
    scf.if %6 {
      %c0_8 = arith.constant 0 : index
      %c0_9 = arith.constant 0 : index
      %c0_10 = arith.constant 0 : index
      %16 = vector.load %arg4[%c0_8, %c0_9, %c0_10] : memref<2x8x32xbf16, #tpu.memory_space<vmem>>, vector<2x8x32xbf16>
      %17 = vector.shape_cast %16 : vector<2x8x32xbf16> to vector<16x32xbf16>
      %c0_11 = arith.constant 0 : index
      %c0_12 = arith.constant 0 : index
      %18 = vector.load %arg5[%c0_11, %c0_12] : memref<32x128xbf16, #tpu.memory_space<vmem>>, vector<32x128xbf16>
      %cst = arith.constant dense<0.000000e+00> : vector<16x128xf32>
      %19 = tpu.matmul %17, %18, %cst {dimension_numbers = #tpu.dot_dimension_numbers<[1], [0], [0], [1], [0, 0, 1, 1], [], []>} : vector<16x32xbf16>, vector<32x128xbf16>, vector<16x128xf32> -> vector<16x128xf32>
      %c0_13 = arith.constant 0 : index
      %c0_14 = arith.constant 0 : index
      %20 = vector.load %arg6[%c0_13, %c0_14] : memref<1x128xf32, #tpu.memory_space<vmem>>, vector<1x128xf32>
      %21 = vector.broadcast %20 : vector<1x128xf32> to vector<16x128xf32>
      %22 = arith.addf %19, %21 : vector<16x128xf32>
      %23 = arith.index_cast %arg2 : i32 to index
      %c0_15 = arith.constant 0 : index
      %c0_16 = arith.constant 0 : index
      %24 = vector.load %arg22[%23, %c0_15, %c0_16] : memref<3x16x128xf32, #tpu.memory_space<vmem>>, vector<1x16x128xf32>
      %25 = vector.shape_cast %24 : vector<1x16x128xf32> to vector<16x128xf32>
      %26 = vector.shape_cast %22 : vector<16x128xf32> to vector<1x16x128xf32>
      tpu.vector_store %arg22[%23, %c0_15, %c0_16], %26 {strides = array<i32>} : memref<3x16x128xf32, #tpu.memory_space<vmem>>, vector<1x16x128xf32>,
    } else {
    }
    %7 = arith.index_cast %arg2 : i32 to index
    %c0_3 = arith.constant 0 : index
    %c0_4 = arith.constant 0 : index
    %8 = vector.load %arg22[%7, %c0_3, %c0_4] : memref<3x16x128xf32, #tpu.memory_space<vmem>>, vector<1x16x128xf32>
    %9 = vector.shape_cast %8 : vector<1x16x128xf32> to vector<16x128xf32>
    %c0_i32_5 = arith.constant 0 : i32
    %10 = arith.cmpi eq, %arg1, %c0_i32_5 : i32
    %11 = arith.extui %10 : i1 to i32
    %c2147483647_i32 = arith.constant 2147483647 : i32
    %c0_i32_6 = arith.constant 0 : i32
    %12 = arith.cmpi ne, %11, %c0_i32_6 : i32
    scf.if %12 {
      %c0_i32_8 = arith.constant 0 : i32
      %16 = arith.cmpi eq, %arg2, %c0_i32_8 : i32
      %17 = arith.extui %16 : i1 to i32
      %c0_i32_9 = arith.constant 0 : i32
      %18 = arith.cmpi ne, %17, %c0_i32_9 : i32
      scf.if %18 {
        %cst_42 = arith.constant 0xFF800000 : f32
        %101 = vector.broadcast %cst_42 : f32 to vector<16x2xf32>
        %c0_43 = arith.constant 0 : index
        %c0_44 = arith.constant 0 : index
        %102 = vector.load %arg18[%c0_43, %c0_44] : memref<16x2xf32, #tpu.memory_space<vmem>>, vector<16x2xf32>
        tpu.vector_store %arg18[%c0_43, %c0_44], %101 {strides = array<i32>} : memref<16x2xf32, #tpu.memory_space<vmem>>, vector<16x2xf32>,
        %c0_i32_45 = arith.constant 0 : i32
        %103 = vector.broadcast %c0_i32_45 : i32 to vector<16x2xi32>
        %c0_46 = arith.constant 0 : index
        %c0_47 = arith.constant 0 : index
        %104 = vector.load %arg19[%c0_46, %c0_47] : memref<16x2xi32, #tpu.memory_space<vmem>>, vector<16x2xi32>
        tpu.vector_store %arg19[%c0_46, %c0_47], %103 {strides = array<i32>} : memref<16x2xi32, #tpu.memory_space<vmem>>, vector<16x2xi32>,
        %cst_48 = arith.constant 0xFF800000 : f32
        %105 = vector.broadcast %cst_48 : f32 to vector<16x1xf32>
        %c0_49 = arith.constant 0 : index
        %c0_50 = arith.constant 0 : index
        %106 = vector.load %arg20[%c0_49, %c0_50] : memref<16x1xf32, #tpu.memory_space<vmem>>, vector<16x1xf32>
        tpu.vector_store %arg20[%c0_49, %c0_50], %105 {strides = array<i32>} : memref<16x1xf32, #tpu.memory_space<vmem>>, vector<16x1xf32>,
        %cst_51 = arith.constant 0.000000e+00 : f32
        %107 = vector.broadcast %cst_51 : f32 to vector<16x1xf32>
        %c0_52 = arith.constant 0 : index
        %c0_53 = arith.constant 0 : index
        %108 = vector.load %arg21[%c0_52, %c0_53] : memref<16x1xf32, #tpu.memory_space<vmem>>, vector<16x1xf32>
        tpu.vector_store %arg21[%c0_52, %c0_53], %107 {strides = array<i32>} : memref<16x1xf32, #tpu.memory_space<vmem>>, vector<16x1xf32>,
      } else {
      }
      %c0_10 = arith.constant 0 : index
      %c0_11 = arith.constant 0 : index
      %19 = vector.load %arg20[%c0_10, %c0_11] : memref<16x1xf32, #tpu.memory_space<vmem>>, vector<16x1xf32>
      %cst = arith.constant dense<0xFF800000> : vector<16xf32>
      %20 = vector.multi_reduction <maximumf>, %9, %cst [1] : vector<16x128xf32> to vector<16xf32>
      %21 = vector.shape_cast %20 : vector<16xf32> to vector<16x1xf32>
      %22 = arith.maximumf %19, %21 : vector<16x1xf32>
      %c0_12 = arith.constant 0 : index
      %c0_13 = arith.constant 0 : index
      %23 = vector.load %arg21[%c0_12, %c0_13] : memref<16x1xf32, #tpu.memory_space<vmem>>, vector<16x1xf32>
      %24 = arith.subf %19, %22 : vector<16x1xf32>
      %25 = math.exp %24 : vector<16x1xf32>
      %26 = arith.mulf %23, %25 : vector<16x1xf32>
      %27 = vector.broadcast %22 : vector<16x1xf32> to vector<16x128xf32>
      %28 = arith.subf %9, %27 : vector<16x128xf32>
      %29 = math.exp %28 : vector<16x128xf32>
      %cst_14 = arith.constant dense<0.000000e+00> : vector<16xf32>
      %30 = vector.multi_reduction <add>, %29, %cst_14 [1] : vector<16x128xf32> to vector<16xf32>
      %31 = vector.shape_cast %30 : vector<16xf32> to vector<16x1xf32>
      %32 = arith.addf %26, %31 : vector<16x1xf32>
      %c0_15 = arith.constant 0 : index
      %c0_16 = arith.constant 0 : index
      %33 = vector.load %arg21[%c0_15, %c0_16] : memref<16x1xf32, #tpu.memory_space<vmem>>, vector<16x1xf32>
      tpu.vector_store %arg21[%c0_15, %c0_16], %32 {strides = array<i32>} : memref<16x1xf32, #tpu.memory_space<vmem>>, vector<16x1xf32>,
      %c0_17 = arith.constant 0 : index
      %c0_18 = arith.constant 0 : index
      %34 = vector.load %arg20[%c0_17, %c0_18] : memref<16x1xf32, #tpu.memory_space<vmem>>, vector<16x1xf32>
      tpu.vector_store %arg20[%c0_17, %c0_18], %22 {strides = array<i32>} : memref<16x1xf32, #tpu.memory_space<vmem>>, vector<16x1xf32>,
      %cst_19 = arith.constant 0.000000e+00 : f32
      %35 = vector.broadcast %cst_19 : f32 to vector<16x128xf32>
      %36 = arith.maximumf %9, %35 : vector<16x128xf32>
      %37 = math.log1p %36 : vector<16x128xf32>
      %38 = vector.broadcast %1 : vector<16x1xf32> to vector<16x128xf32>
      %39 = arith.mulf %37, %38 : vector<16x128xf32>
      %40 = vector.shape_cast %39 : vector<16x128xf32> to vector<2x8x128xf32>
      %cst_20 = arith.constant dense<0xFF800000> : vector<2x128xf32>
      %41 = vector.multi_reduction <maximumf>, %40, %cst_20 [1] : vector<2x8x128xf32> to vector<2x128xf32>
      %42 = vector.shape_cast %41 : vector<2x128xf32> to vector<2x1x128xf32>
      %c0_21 = arith.constant 0 : index
      %c0_22 = arith.constant 0 : index
      %c0_23 = arith.constant 0 : index
      %43 = vector.load %arg11[%c0_21, %c0_22, %c0_23] : memref<2x1x128xf32, #tpu.memory_space<vmem>>, vector<2x1x128xf32>
      tpu.vector_store %arg11[%c0_21, %c0_22, %c0_23], %42 {strides = array<i32>} : memref<2x1x128xf32, #tpu.memory_space<vmem>>, vector<2x1x128xf32>,
      %cst_24 = arith.constant dense<0xFF800000> : vector<16xf32>
      %44 = vector.multi_reduction <maximumf>, %39, %cst_24 [1] : vector<16x128xf32> to vector<16xf32>
      %45 = vector.shape_cast %44 : vector<16xf32> to vector<16x1xf32>
      %46 = vector.broadcast %45 : vector<16x1xf32> to vector<16x128xf32>
      %47 = arith.cmpf oge, %39, %46 : vector<16x128xf32>
      %48 = vector.shape_cast %2 : vector<1x128xi32> to vector<1x128xi32>
      %49 = vector.broadcast %48 : vector<1x128xi32> to vector<16x128xi32>
      %50 = vector.broadcast %c2147483647_i32 : i32 to vector<16x128xi32>
      %51 = arith.select %47, %49, %50 : vector<16x128xi1>, vector<16x128xi32>
      %cst_25 = arith.constant dense<2147483647> : vector<16xi32>
      %52 = vector.multi_reduction <minsi>, %51, %cst_25 [1] : vector<16x128xi32> to vector<16xi32>
      %53 = vector.shape_cast %52 : vector<16xi32> to vector<16x1xi32>
      %54 = vector.broadcast %3 : i32 to vector<16x1xi32>
      %55 = arith.addi %53, %54 : vector<16x1xi32>
      %56 = vector.broadcast %2 : vector<1x128xi32> to vector<16x128xi32>
      %57 = vector.broadcast %53 : vector<16x1xi32> to vector<16x128xi32>
      %58 = arith.cmpi eq, %56, %57 : vector<16x128xi32>
      %cst_26 = arith.constant 0xFF800000 : f32
      %59 = vector.broadcast %cst_26 : f32 to vector<16x128xf32>
      %60 = arith.select %58, %59, %39 : vector<16x128xi1>, vector<16x128xf32>
      %cst_27 = arith.constant dense<0xFF800000> : vector<16xf32>
      %61 = vector.multi_reduction <maximumf>, %60, %cst_27 [1] : vector<16x128xf32> to vector<16xf32>
      %62 = vector.shape_cast %61 : vector<16xf32> to vector<16x1xf32>
      %63 = vector.broadcast %62 : vector<16x1xf32> to vector<16x128xf32>
      %64 = arith.cmpf oge, %60, %63 : vector<16x128xf32>
      %65 = vector.shape_cast %2 : vector<1x128xi32> to vector<1x128xi32>
      %66 = vector.broadcast %65 : vector<1x128xi32> to vector<16x128xi32>
      %67 = vector.broadcast %c2147483647_i32 : i32 to vector<16x128xi32>
      %68 = arith.select %64, %66, %67 : vector<16x128xi1>, vector<16x128xi32>
      %cst_28 = arith.constant dense<2147483647> : vector<16xi32>
      %69 = vector.multi_reduction <minsi>, %68, %cst_28 [1] : vector<16x128xi32> to vector<16xi32>
      %70 = vector.shape_cast %69 : vector<16xi32> to vector<16x1xi32>
      %71 = vector.broadcast %3 : i32 to vector<16x1xi32>
      %72 = arith.addi %70, %71 : vector<16x1xi32>
      %c0_29 = arith.constant 0 : index
      %c0_30 = arith.constant 0 : index
      %73 = vector.load %arg18[%c0_29, %c0_30] : memref<16x2xf32, #tpu.memory_space<vmem>>, vector<16x2xf32>
      %74 = tpu.concatenate %73, %45, %62 in 1 : vector<16x2xf32>, vector<16x1xf32>, vector<16x1xf32> -> vector<16x4xf32>
      %c0_31 = arith.constant 0 : index
      %c0_32 = arith.constant 0 : index
      %75 = vector.load %arg19[%c0_31, %c0_32] : memref<16x2xi32, #tpu.memory_space<vmem>>, vector<16x2xi32>
      %76 = tpu.concatenate %75, %55, %72 in 1 : vector<16x2xi32>, vector<16x1xi32>, vector<16x1xi32> -> vector<16x4xi32>
      %cst_33 = arith.constant dense<0xFF800000> : vector<16xf32>
      %77 = vector.multi_reduction <maximumf>, %74, %cst_33 [1] : vector<16x4xf32> to vector<16xf32>
      %78 = vector.shape_cast %77 : vector<16xf32> to vector<16x1xf32>
      %79 = vector.broadcast %78 : vector<16x1xf32> to vector<16x4xf32>
      %80 = arith.cmpf oge, %74, %79 : vector<16x4xf32>
      %81 = vector.broadcast %c2147483647_i32 : i32 to vector<16x4xi32>
      %82 = arith.select %80, %76, %81 : vector<16x4xi1>, vector<16x4xi32>
      %cst_34 = arith.constant dense<2147483647> : vector<16xi32>
      %83 = vector.multi_reduction <minsi>, %82, %cst_34 [1] : vector<16x4xi32> to vector<16xi32>
      %84 = vector.shape_cast %83 : vector<16xi32> to vector<16x1xi32>
      %85 = vector.broadcast %84 : vector<16x1xi32> to vector<16x4xi32>
      %86 = arith.cmpi eq, %76, %85 : vector<16x4xi32>
      %cst_35 = arith.constant 0xFF800000 : f32
      %87 = vector.broadcast %cst_35 : f32 to vector<16x4xf32>
      %88 = arith.select %86, %87, %74 : vector<16x4xi1>, vector<16x4xf32>
      %cst_36 = arith.constant dense<0xFF800000> : vector<16xf32>
      %89 = vector.multi_reduction <maximumf>, %88, %cst_36 [1] : vector<16x4xf32> to vector<16xf32>
      %90 = vector.shape_cast %89 : vector<16xf32> to vector<16x1xf32>
      %91 = vector.broadcast %90 : vector<16x1xf32> to vector<16x4xf32>
      %92 = arith.cmpf oge, %88, %91 : vector<16x4xf32>
      %93 = vector.broadcast %c2147483647_i32 : i32 to vector<16x4xi32>
      %94 = arith.select %92, %76, %93 : vector<16x4xi1>, vector<16x4xi32>
      %cst_37 = arith.constant dense<2147483647> : vector<16xi32>
      %95 = vector.multi_reduction <minsi>, %94, %cst_37 [1] : vector<16x4xi32> to vector<16xi32>
      %96 = vector.shape_cast %95 : vector<16xi32> to vector<16x1xi32>
      %97 = tpu.concatenate %78, %90 in 1 : vector<16x1xf32>, vector<16x1xf32> -> vector<16x2xf32>
      %c0_38 = arith.constant 0 : index
      %c0_39 = arith.constant 0 : index
      %98 = vector.load %arg18[%c0_38, %c0_39] : memref<16x2xf32, #tpu.memory_space<vmem>>, vector<16x2xf32>
      tpu.vector_store %arg18[%c0_38, %c0_39], %97 {strides = array<i32>} : memref<16x2xf32, #tpu.memory_space<vmem>>, vector<16x2xf32>,
      %99 = tpu.concatenate %84, %96 in 1 : vector<16x1xi32>, vector<16x1xi32> -> vector<16x2xi32>
      %c0_40 = arith.constant 0 : index
      %c0_41 = arith.constant 0 : index
      %100 = vector.load %arg19[%c0_40, %c0_41] : memref<16x2xi32, #tpu.memory_space<vmem>>, vector<16x2xi32>
      tpu.vector_store %arg19[%c0_40, %c0_41], %99 {strides = array<i32>} : memref<16x2xi32, #tpu.memory_space<vmem>>, vector<16x2xi32>,
    } else {
    }
    %c1_i32 = arith.constant 1 : i32
    %13 = arith.cmpi eq, %arg1, %c1_i32 : i32
    %14 = arith.extui %13 : i1 to i32
    %c0_i32_7 = arith.constant 0 : i32
    %15 = arith.cmpi ne, %14, %c0_i32_7 : i32
    scf.if %15 {
      %16 = tpu.iota {dimensions = array<i32: 1>} : vector<2x8x1xi32>
      %c0_i32_8 = arith.constant 0 : i32
      %17 = vector.broadcast %c0_i32_8 : i32 to vector<2x8x1xi32>
      %18 = arith.cmpi sgt, %16, %17 : vector<2x8x1xi32>
      %19 = arith.extui %18 : vector<2x8x1xi1> to vector<2x8x1xi32>
      %20 = arith.sitofp %19 : vector<2x8x1xi32> to vector<2x8x1xf32>
      %c0_9 = arith.constant 0 : index
      %c0_10 = arith.constant 0 : index
      %21 = vector.load %arg20[%c0_9, %c0_10] : memref<16x1xf32, #tpu.memory_space<vmem>>, vector<16x1xf32>
      %22 = vector.broadcast %21 : vector<16x1xf32> to vector<16x128xf32>
      %23 = arith.subf %9, %22 : vector<16x128xf32>
      %24 = math.exp %23 : vector<16x128xf32>
      %c0_11 = arith.constant 0 : index
      %c0_12 = arith.constant 0 : index
      %25 = vector.load %arg21[%c0_11, %c0_12] : memref<16x1xf32, #tpu.memory_space<vmem>>, vector<16x1xf32>
      %cst = arith.constant 1.000000e+00 : f32
      %26 = vector.broadcast %cst : f32 to vector<16x1xf32>
      %27 = arith.divf %26, %25 : vector<16x1xf32>
      %28 = vector.broadcast %27 : vector<16x1xf32> to vector<16x128xf32>
      %29 = arith.mulf %24, %28 : vector<16x128xf32>
      %30 = vector.shape_cast %29 : vector<16x128xf32> to vector<2x8x128xf32>
      %31 = vector.broadcast %20 : vector<2x8x1xf32> to vector<2x8x128xf32>
      %32 = arith.mulf %30, %31 : vector<2x8x128xf32>
      %cst_13 = arith.constant dense<0.000000e+00> : vector<2x128xf32>
      %33 = vector.multi_reduction <add>, %32, %cst_13 [1] : vector<2x8x128xf32> to vector<2x128xf32>
      %34 = vector.shape_cast %33 : vector<2x128xf32> to vector<2x1x128xf32>
      %c0_14 = arith.constant 0 : index
      %c0_15 = arith.constant 0 : index
      %c0_16 = arith.constant 0 : index
      %35 = vector.load %arg13[%c0_14, %c0_15, %c0_16] : memref<2x1x128xf32, #tpu.memory_space<vmem>>, vector<2x1x128xf32>
      tpu.vector_store %arg13[%c0_14, %c0_15, %c0_16], %34 {strides = array<i32>} : memref<2x1x128xf32, #tpu.memory_space<vmem>>, vector<2x1x128xf32>,
      %c0_17 = arith.constant 0 : index
      %c0_18 = arith.constant 0 : index
      %36 = vector.load %arg18[%c0_17, %c0_18] : memref<16x2xf32, #tpu.memory_space<vmem>>, vector<16x2xf32>
      %c0_19 = arith.constant 0 : index
      %c0_20 = arith.constant 0 : index
      %37 = vector.load %arg19[%c0_19, %c0_20] : memref<16x2xi32, #tpu.memory_space<vmem>>, vector<16x2xi32>
      %cst_21 = arith.constant 0.000000e+00 : f32
      %38 = vector.broadcast %cst_21 : f32 to vector<16x128xf32>
      %39 = vector.extract_strided_slice %37 {offsets = [0, 0], sizes = [16, 1], strides = [1, 1]} : vector<16x2xi32> to vector<16x1xi32>
      %40 = vector.broadcast %3 : i32 to vector<16x1xi32>
      %41 = arith.subi %39, %40 : vector<16x1xi32>
      %42 = vector.extract_strided_slice %36 {offsets = [0, 0], sizes = [16, 1], strides = [1, 1]} : vector<16x2xf32> to vector<16x1xf32>
      %cst_22 = arith.constant 0.000000e+00 : f32
      %43 = vector.broadcast %cst_22 : f32 to vector<16x1xf32>
      %44 = arith.cmpf ogt, %42, %43 : vector<16x1xf32>
      %c0_i32_23 = arith.constant 0 : i32
      %45 = vector.broadcast %c0_i32_23 : i32 to vector<16x1xi32>
      %46 = arith.cmpi sge, %41, %45 : vector<16x1xi32>
      %c128_i32_24 = arith.constant 128 : i32
      %47 = vector.broadcast %c128_i32_24 : i32 to vector<16x1xi32>
      %48 = arith.cmpi slt, %41, %47 : vector<16x1xi32>
      %49 = arith.andi %46, %48 : vector<16x1xi1>
      %50 = arith.andi %44, %49 : vector<16x1xi1>
      %51 = vector.broadcast %2 : vector<1x128xi32> to vector<16x128xi32>
      %52 = vector.broadcast %41 : vector<16x1xi32> to vector<16x128xi32>
      %53 = arith.cmpi eq, %51, %52 : vector<16x128xi32>
      %54 = vector.broadcast %50 : vector<16x1xi1> to vector<16x128xi1>
      %55 = arith.andi %53, %54 : vector<16x128xi1>
      %cst_25 = arith.constant 1.000000e+00 : f32
      %cst_26 = arith.constant 0.000000e+00 : f32
      %56 = vector.broadcast %cst_25 : f32 to vector<16x128xf32>
      %57 = vector.broadcast %cst_26 : f32 to vector<16x128xf32>
      %58 = arith.select %55, %56, %57 : vector<16x128xi1>, vector<16x128xf32>
      %59 = arith.addf %38, %58 : vector<16x128xf32>
      %60 = vector.extract_strided_slice %37 {offsets = [0, 1], sizes = [16, 1], strides = [1, 1]} : vector<16x2xi32> to vector<16x1xi32>
      %61 = vector.broadcast %3 : i32 to vector<16x1xi32>
      %62 = arith.subi %60, %61 : vector<16x1xi32>
      %63 = vector.extract_strided_slice %36 {offsets = [0, 1], sizes = [16, 1], strides = [1, 1]} : vector<16x2xf32> to vector<16x1xf32>
      %cst_27 = arith.constant 0.000000e+00 : f32
      %64 = vector.broadcast %cst_27 : f32 to vector<16x1xf32>
      %65 = arith.cmpf ogt, %63, %64 : vector<16x1xf32>
      %c0_i32_28 = arith.constant 0 : i32
      %66 = vector.broadcast %c0_i32_28 : i32 to vector<16x1xi32>
      %67 = arith.cmpi sge, %62, %66 : vector<16x1xi32>
      %c128_i32_29 = arith.constant 128 : i32
      %68 = vector.broadcast %c128_i32_29 : i32 to vector<16x1xi32>
      %69 = arith.cmpi slt, %62, %68 : vector<16x1xi32>
      %70 = arith.andi %67, %69 : vector<16x1xi1>
      %71 = arith.andi %65, %70 : vector<16x1xi1>
      %72 = vector.broadcast %2 : vector<1x128xi32> to vector<16x128xi32>
      %73 = vector.broadcast %62 : vector<16x1xi32> to vector<16x128xi32>
      %74 = arith.cmpi eq, %72, %73 : vector<16x128xi32>
      %75 = vector.broadcast %71 : vector<16x1xi1> to vector<16x128xi1>
      %76 = arith.andi %74, %75 : vector<16x128xi1>
      %cst_30 = arith.constant 1.000000e+00 : f32
      %cst_31 = arith.constant 0.000000e+00 : f32
      %77 = vector.broadcast %cst_30 : f32 to vector<16x128xf32>
      %78 = vector.broadcast %cst_31 : f32 to vector<16x128xf32>
      %79 = arith.select %76, %77, %78 : vector<16x128xi1>, vector<16x128xf32>
      %80 = arith.addf %59, %79 : vector<16x128xf32>
      %81 = vector.shape_cast %80 : vector<16x128xf32> to vector<2x8x128xf32>
      %cst_32 = arith.constant dense<0.000000e+00> : vector<2x128xf32>
      %82 = vector.multi_reduction <add>, %81, %cst_32 [1] : vector<2x8x128xf32> to vector<2x128xf32>
      %83 = vector.shape_cast %82 : vector<2x128xf32> to vector<2x1x128xf32>
      %c0_33 = arith.constant 0 : index
      %c0_34 = arith.constant 0 : index
      %c0_35 = arith.constant 0 : index
      %84 = vector.load %arg12[%c0_33, %c0_34, %c0_35] : memref<2x1x128xf32, #tpu.memory_space<vmem>>, vector<2x1x128xf32>
      tpu.vector_store %arg12[%c0_33, %c0_34, %c0_35], %83 {strides = array<i32>} : memref<2x1x128xf32, #tpu.memory_space<vmem>>, vector<2x1x128xf32>,
      %c2_i32 = arith.constant 2 : i32
      %85 = arith.cmpi eq, %arg2, %c2_i32 : i32
      %86 = arith.extui %85 : i1 to i32
      %c0_i32_36 = arith.constant 0 : i32
      %87 = arith.cmpi ne, %86, %c0_i32_36 : i32
      scf.if %87 {
        %88 = vector.shape_cast %36 : vector<16x2xf32> to vector<2x8x2xf32>
        %c0_37 = arith.constant 0 : index
        %c0_38 = arith.constant 0 : index
        %c0_39 = arith.constant 0 : index
        %89 = vector.load %arg14[%c0_37, %c0_38, %c0_39] : memref<2x8x2xf32, #tpu.memory_space<vmem>>, vector<2x8x2xf32>
        tpu.vector_store %arg14[%c0_37, %c0_38, %c0_39], %88 {strides = array<i32>} : memref<2x8x2xf32, #tpu.memory_space<vmem>>, vector<2x8x2xf32>,
        %90 = vector.shape_cast %37 : vector<16x2xi32> to vector<2x8x2xi32>
        %c0_40 = arith.constant 0 : index
        %c0_41 = arith.constant 0 : index
        %c0_42 = arith.constant 0 : index
        %91 = vector.load %arg15[%c0_40, %c0_41, %c0_42] : memref<2x8x2xi32, #tpu.memory_space<vmem>>, vector<2x8x2xi32>
        tpu.vector_store %arg15[%c0_40, %c0_41, %c0_42], %90 {strides = array<i32>} : memref<2x8x2xi32, #tpu.memory_space<vmem>>, vector<2x8x2xi32>,
        %c0_43 = arith.constant 0 : index
        %c0_44 = arith.constant 0 : index
        %c0_45 = arith.constant 0 : index
        %92 = vector.load %arg4[%c0_43, %c0_44, %c0_45] : memref<2x8x32xbf16, #tpu.memory_space<vmem>>, vector<2x8x32xbf16>
        %93 = vector.shape_cast %92 : vector<2x8x32xbf16> to vector<16x32xbf16>
        %c0_46 = arith.constant 0 : index
        %c0_47 = arith.constant 0 : index
        %94 = vector.load %arg7[%c0_46, %c0_47] : memref<32x16xbf16, #tpu.memory_space<vmem>>, vector<32x16xbf16>
        %cst_48 = arith.constant dense<0.000000e+00> : vector<16x16xf32>
        %95 = tpu.matmul %93, %94, %cst_48 {dimension_numbers = #tpu.dot_dimension_numbers<[1], [0], [0], [1], [0, 0, 1, 1], [], []>} : vector<16x32xbf16>, vector<32x16xbf16>, vector<16x16xf32> -> vector<16x16xf32>
        %c0_49 = arith.constant 0 : index
        %c0_50 = arith.constant 0 : index
        %96 = vector.load %arg8[%c0_49, %c0_50] : memref<1x16xf32, #tpu.memory_space<vmem>>, vector<1x16xf32>
        %97 = vector.broadcast %96 : vector<1x16xf32> to vector<16x16xf32>
        %98 = arith.addf %95, %97 : vector<16x16xf32>
        %99 = vector.broadcast %1 : vector<16x1xf32> to vector<16x16xf32>
        %100 = arith.mulf %98, %99 : vector<16x16xf32>
        %101 = vector.shape_cast %100 : vector<16x16xf32> to vector<2x8x16xf32>
        %c0_51 = arith.constant 0 : index
        %c0_52 = arith.constant 0 : index
        %c0_53 = arith.constant 0 : index
        %102 = vector.load %arg16[%c0_51, %c0_52, %c0_53] : memref<2x8x16xf32, #tpu.memory_space<vmem>>, vector<2x8x16xf32>
        tpu.vector_store %arg16[%c0_51, %c0_52, %c0_53], %101 {strides = array<i32>} : memref<2x8x16xf32, #tpu.memory_space<vmem>>, vector<2x8x16xf32>,
        %103 = vector.extract_strided_slice %92 {offsets = [0, 0, 0], sizes = [2, 1, 32], strides = [1, 1, 1]} : vector<2x8x32xbf16> to vector<2x1x32xbf16>
        %104 = vector.shape_cast %103 : vector<2x1x32xbf16> to vector<2x32xbf16>
        %c0_54 = arith.constant 0 : index
        %c0_55 = arith.constant 0 : index
        %105 = vector.load %arg9[%c0_54, %c0_55] : memref<32x16xbf16, #tpu.memory_space<vmem>>, vector<32x16xbf16>
        %cst_56 = arith.constant dense<0.000000e+00> : vector<2x16xf32>
        %106 = tpu.matmul %104, %105, %cst_56 {dimension_numbers = #tpu.dot_dimension_numbers<[1], [0], [0], [1], [0, 0, 1, 1], [], []>} : vector<2x32xbf16>, vector<32x16xbf16>, vector<2x16xf32> -> vector<2x16xf32>
        %c0_57 = arith.constant 0 : index
        %c0_58 = arith.constant 0 : index
        %107 = vector.load %arg10[%c0_57, %c0_58] : memref<1x16xf32, #tpu.memory_space<vmem>>, vector<1x16xf32>
        %108 = vector.broadcast %107 : vector<1x16xf32> to vector<2x16xf32>
        %109 = arith.addf %106, %108 : vector<2x16xf32>
        %110 = vector.shape_cast %109 : vector<2x16xf32> to vector<2x1x16xf32>
        %c0_59 = arith.constant 0 : index
        %c0_60 = arith.constant 0 : index
        %c0_61 = arith.constant 0 : index
        %111 = vector.load %arg17[%c0_59, %c0_60, %c0_61] : memref<2x1x16xf32, #tpu.memory_space<vmem>>, vector<2x1x16xf32>
        tpu.vector_store %arg17[%c0_59, %c0_60, %c0_61], %110 {strides = array<i32>} : memref<2x1x16xf32, #tpu.memory_space<vmem>>, vector<2x1x16xf32>,
      } else {
      }
    } else {
    }
    return
  }
  func.func @transform_0(%arg0: i32, %arg1: i32, %arg2: i32) -> (i32, i32, i32) {
    %c0_i32 = arith.constant 0 : i32
    %c0_i32_0 = arith.constant 0 : i32
    %c0_i32_1 = arith.constant 0 : i32
    return %arg0, %c0_i32, %c0_i32_0 : i32, i32, i32
  }
  func.func @transform_1(%arg0: i32, %arg1: i32, %arg2: i32) -> (i32, i32, i32) {
    %c0_i32 = arith.constant 0 : i32
    %c0_i32_0 = arith.constant 0 : i32
    %c0_i32_1 = arith.constant 0 : i32
    return %arg0, %c0_i32, %c0_i32_0 : i32, i32, i32
  }
  func.func @transform_2(%arg0: i32, %arg1: i32, %arg2: i32) -> (i32, i32) {
    %c1_i32 = arith.constant 1 : i32
    %0 = arith.subi %c1_i32, %arg1 : i32
    %1 = arith.muli %arg2, %0 : i32
    %c2_i32 = arith.constant 2 : i32
    %2 = arith.muli %c2_i32, %arg1 : i32
    %3 = arith.addi %1, %2 : i32
    %c0_i32 = arith.constant 0 : i32
    %c0_i32_0 = arith.constant 0 : i32
    return %c0_i32, %3 : i32, i32
  }
  func.func @transform_3(%arg0: i32, %arg1: i32, %arg2: i32) -> (i32, i32) {
    %c1_i32 = arith.constant 1 : i32
    %0 = arith.subi %c1_i32, %arg1 : i32
    %1 = arith.muli %arg2, %0 : i32
    %c2_i32 = arith.constant 2 : i32
    %2 = arith.muli %c2_i32, %arg1 : i32
    %3 = arith.addi %1, %2 : i32
    %c0_i32 = arith.constant 0 : i32
    %c0_i32_0 = arith.constant 0 : i32
    return %c0_i32, %3 : i32, i32
  }
  func.func @transform_4(%arg0: i32, %arg1: i32, %arg2: i32) -> (i32, i32) {
    %c0_i32 = arith.constant 0 : i32
    %c0_i32_0 = arith.constant 0 : i32
    %c0_i32_1 = arith.constant 0 : i32
    return %c0_i32, %c0_i32_0 : i32, i32
  }
  func.func @transform_5(%arg0: i32, %arg1: i32, %arg2: i32) -> (i32, i32) {
    %c0_i32 = arith.constant 0 : i32
    %c0_i32_0 = arith.constant 0 : i32
    %c0_i32_1 = arith.constant 0 : i32
    return %c0_i32, %c0_i32_0 : i32, i32
  }
  func.func @transform_6(%arg0: i32, %arg1: i32, %arg2: i32) -> (i32, i32) {
    %c0_i32 = arith.constant 0 : i32
    %c0_i32_0 = arith.constant 0 : i32
    %c0_i32_1 = arith.constant 0 : i32
    return %c0_i32, %c0_i32_0 : i32, i32
  }
  func.func @transform_7(%arg0: i32, %arg1: i32, %arg2: i32) -> (i32, i32) {
    %c0_i32 = arith.constant 0 : i32
    %c0_i32_0 = arith.constant 0 : i32
    %c0_i32_1 = arith.constant 0 : i32
    return %c0_i32, %c0_i32_0 : i32, i32
  }
  func.func @transform_8(%arg0: i32, %arg1: i32, %arg2: i32) -> (i32, i32, i32) {
    %c1_i32 = arith.constant 1 : i32
    %0 = arith.subi %c1_i32, %arg1 : i32
    %1 = arith.muli %arg2, %0 : i32
    %c2_i32 = arith.constant 2 : i32
    %2 = arith.muli %c2_i32, %arg1 : i32
    %3 = arith.addi %1, %2 : i32
    %c0_i32 = arith.constant 0 : i32
    %c0_i32_0 = arith.constant 0 : i32
    return %arg0, %c0_i32, %3 : i32, i32, i32
  }
  func.func @transform_9(%arg0: i32, %arg1: i32, %arg2: i32) -> (i32, i32, i32) {
    %0 = arith.muli %arg1, %arg2 : i32
    %c0_i32 = arith.constant 0 : i32
    %c0_i32_0 = arith.constant 0 : i32
    return %arg0, %c0_i32, %0 : i32, i32, i32
  }
  func.func @transform_10(%arg0: i32, %arg1: i32, %arg2: i32) -> (i32, i32, i32) {
    %0 = arith.muli %arg1, %arg2 : i32
    %c0_i32 = arith.constant 0 : i32
    %c0_i32_0 = arith.constant 0 : i32
    return %arg0, %c0_i32, %0 : i32, i32, i32
  }
  func.func @transform_11(%arg0: i32, %arg1: i32, %arg2: i32) -> (i32, i32, i32) {
    %c0_i32 = arith.constant 0 : i32
    %c0_i32_0 = arith.constant 0 : i32
    %c0_i32_1 = arith.constant 0 : i32
    return %arg0, %c0_i32, %c0_i32_0 : i32, i32, i32
  }
  func.func @transform_12(%arg0: i32, %arg1: i32, %arg2: i32) -> (i32, i32, i32) {
    %c0_i32 = arith.constant 0 : i32
    %c0_i32_0 = arith.constant 0 : i32
    %c0_i32_1 = arith.constant 0 : i32
    return %arg0, %c0_i32, %c0_i32_0 : i32, i32, i32
  }
  func.func @transform_13(%arg0: i32, %arg1: i32, %arg2: i32) -> (i32, i32, i32) {
    %c0_i32 = arith.constant 0 : i32
    %c0_i32_0 = arith.constant 0 : i32
    %c0_i32_1 = arith.constant 0 : i32
    return %arg0, %c0_i32, %c0_i32_0 : i32, i32, i32
  }
  func.func @transform_14(%arg0: i32, %arg1: i32, %arg2: i32) -> (i32, i32, i32) {
    %c0_i32 = arith.constant 0 : i32
    %c0_i32_0 = arith.constant 0 : i32
    %c0_i32_1 = arith.constant 0 : i32
    return %arg0, %c0_i32, %c0_i32_0 : i32, i32, i32
  }
}

</mosaic_0001>

<bundles_post_ra>
// kernel: tpu_custom_call.1
= control target key start
LH: loop header
LB: loop body
LE: loop exit
PB: predicated region body
PF: predicated region fallthrough
CT: control target
= control target key end

     0   :  { %s2828_s0 = inlined_call_operand.vmem [shape: f32[2,8,1], index: 0, kind: input, shape index: {}]   ;;  %s2829_s1 = inlined_call_operand.vmem [shape: bf16[2,8,32], index: 1, kind: input, shape index: {}]   ;;  %s2830_s2 = inlined_call_operand.vmem [shape: bf16[32,384], index: 2, kind: input, shape index: {}]   ;;  %s2831_s3 = inlined_call_operand.vmem [shape: f32[1,384], index: 3, kind: input, shape index: {}]   ;;  %s2832_s4 = inlined_call_operand.vmem [shape: bf16[32,16], index: 4, kind: input, shape index: {}]   ;;  %s2833_s5 = inlined_call_operand.vmem [shape: f32[1,16], index: 5, kind: input, shape index: {}]   ;;  %s2834_s6 = inlined_call_operand.vmem [shape: bf16[32,16], index: 6, kind: input, shape index: {}]   ;;  %s2835_s7 = inlined_call_operand.vmem [shape: f32[1,16], index: 7, kind: input, shape index: {}]   ;;  %s2836_s8 = inlined_call_operand.hbm [shape: f32[2,1,384], index: 8, kind: output, shape index: {0}]   ;;  %s2837_s9 = inlined_call_operand.hbm [shape: f32[2,1,384], index: 9, kind: output, shape index: {1}]   ;;  %s2838_s10 = inlined_call_operand.hbm [shape: f32[2,1,384], index: 10, kind: output, shape index: {2}]   ;;  %s2839_s11 = inlined_call_operand.vmem [shape: f32[2,8,2], index: 11, kind: output, shape index: {3}]   ;;  %s2840_s12 = inlined_call_operand.vmem [shape: s32[2,8,2], index: 12, kind: output, shape index: {4}]   ;;  %s2841_s13 = inlined_call_operand.hbm [shape: f32[2,8,16], index: 13, kind: output, shape index: {5}]   ;;  %s2842_s14 = inlined_call_operand.hbm [shape: f32[2,1,16], index: 14, kind: output, shape index: {6}]  }
   0x1   :  { %2870 = sst [smem:[#allocation32_spill]] %s2828_s0 }
   0x2   :  { %2871 = sst [smem:[#allocation33_spill]] %s2829_s1 }
   0x3   :  { %2872 = sst [smem:[#allocation34_spill]] %s2830_s2 }
   0x4   :  { %2873 = sst [smem:[#allocation35_spill]] %s2831_s3 }
   0x5   :  { %2874 = sst [smem:[#allocation36_spill]] %s2832_s4 }
   0x6   :  { %2875 = sst [smem:[#allocation37_spill]] %s2833_s5 }
   0x7   :  { %2876 = sst [smem:[#allocation38_spill]] %s2834_s6 }
   0x8   :  { %2877 = sst [smem:[#allocation39_spill]] %s2835_s7 }
   0x9   :  { %2878 = sst [smem:[#allocation40_spill]] %s2836_s8 }
   0xa   :  { %2879 = sst [smem:[#allocation41_spill]] %s2837_s9 }
   0xb   :  { %2880 = sst [smem:[#allocation42_spill]] %s2838_s10 }
   0xc   :  { %2881 = sst [smem:[#allocation43_spill]] %s2839_s11 }
   0xd   :  { %2882 = sst [smem:[#allocation44_spill]] %s2840_s12 }
   0xe   :  { %2883 = sst [smem:[#allocation45_spill]] %s2841_s13 }
   0xf   :  { %2884 = sst [smem:[#allocation46_spill]] %s2842_s14 }
  0x10   :  { %20 = vsyncpa [#allocation9], 0 }
  0x11   :  { %22 = vsyncpa [#allocation9 + $0x1], 0 }
  0x12   :  { %23 = vsyncpa [#allocation11], 0 }
  0x13   :  { %25 = vsyncpa [#allocation11 + $0x1], 0 }
  0x14   :  { %26 = vsyncpa [#allocation14], 0  ;;  %s2333_s29 = smov 0   ;;  %s2335_s30 = smov 0  }
  0x15   :  { %s2337_s15 = smov 0   ;;  %s2339_s16 = smov 0  }
  0x16   :  { %s2341_s17 = smov 0   ;;  %s2343_s18 = smov 0  }
  0x17   :  { %s2345_s19 = smov 0   ;;  %s2347_s20 = smov 0  }
  0x18   :  { %s2349_s21 = smov 0   ;;  %s2351_s22 = smov 0  }
  0x19   :  { %s2353_s23 = smov 0  }
  0x1a LB: > { %2885 = sst [smem:[#allocation19_spill]] %s2205_s30  ;;  %s44_s26 = sadd.s32 1, %s2233_s21  ;;  %s2241_s23 = sphi %s2353_s23, %s32_s23   ;;  %s2237_s22 = sphi %s2351_s22, %s2941_s22   ;;  %s2233_s21 = sphi %s2349_s21, %s2940_s21   ;;  %s2229_s20 = sphi %s2347_s20, %s2939_s20   ;;  %s2225_s19 = sphi %s2345_s19, %s2938_s19   ;;  %s2221_s18 = sphi %s2343_s18, %s2937_s18   ;;  %s2217_s17 = sphi %s2341_s17, %s2936_s17   ;;  %s2213_s16 = sphi %s2339_s16, %s2935_s16   ;;  %s2209_s15 = sphi %s2337_s15, %s2934_s15   ;;  %s2205_s30 = sphi %s2335_s30, %s2933_s30   ;;  %s2201_s29 = sphi %s2333_s29, %s2932_s29  }
  0x1b   : > { %2886 = sst [smem:[#allocation20_spill]] %s2209_s15  ;;  %s47_s27 = sadd.s32 1, %s2237_s22 }
  0x1c   : > { %2887 = sst [smem:[#allocation21_spill]] %s2213_s16  ;;  %p45_p0 = scmp.ge.s32.totalorder %s44_s26, 3 }
  0x1d   : > { %2888 = sst [smem:[#allocation22_spill]] %s2217_s17  ;;  %s107_s28 = ssub.s32 1, %s2237_s22 }
  0x1e   : > { %2889 = sst [smem:[#allocation23_spill]] %s2221_s18  ;;  %s108_s14 = smul.u32 %s2233_s21, %s107_s28 }
  0x1f   : > { %2890 = sst [smem:[#allocation24_spill]] %s2233_s21  ;;  %s1750_s10 = sshll.u32 %s2237_s22, 1 }
  0x20   : > { %2891 = sst [smem:[#allocation25_spill]] %s2237_s22  ;;  %s2943_s26 = smov (%p45_p0, %s44_s26), 0 }
  0x21   : > { %2892 = sst [smem:[#allocation26_spill]] %s2943_s26  ;;  %s2945_s27 = smov (!%p45_p0, %s47_s27), %s2237_s22 }
  0x22   : > { %s2398_s8 = sadd.s32 %s1750_s10, %s108_s14  ;;  %s118_s24 = sadd.s32 1, %s2221_s18 }
  0x23   : > { %p49_p1 = scmp.ge.s32.totalorder %s2945_s27, 2  ;;  %p125_p2 = scmp.ne.s32.totalorder %s2221_s18, %s2217_s17 }
  0x24   : > { %p126_p3 = scmp.eq.s32.totalorder %s2241_s23, 0  ;;  %s2893_s25 = sadd.s32 4294967295, %s2241_s23  }
  0x25   : > { %p2406_p4 = scmp.eq.s32.totalorder %s2893_s25, 5  ;;  %s2947_s27 = smov (%p49_p1, %s2945_s27), 0 }
  0x26   : > { %2895 = sst [smem:[#allocation27_spill]] %s2947_s27  ;;  %p2412_p5 = por %p126_p3, %p125_p2 }
  0x27   : > { %p2418_p6 = por %p2406_p4, %p125_p2  ;;  %s111_s25 = ssub.s32 1, %s2947_s27 }
  0x28   : > { %s1751_s13 = sshll.u32 %s2947_s27, 1  ;;  %s112_s9 = smul.u32 %s111_s25, %s2943_s26 }
  0x29   : > { %s2897_s14 = scalar_select %p2418_p6, 1, 0 }
  0x2a   : > { %p288_p7 = scmp.ne.s32.totalorder %s2217_s17, %s2213_s16  ;;  %s2899_s7 = sadd.s32 4294967294, %s2241_s23  }
  0x2b   : > { %2898 = sst [smem:[#allocation28_spill]] %s2897_s14  ;;  %p2429_p8 = scmp.eq.s32.totalorder %s2899_s7, 5 }
  0x2c   : > { %s295_s12 = smul.u32 %s2233_s21, %s2237_s22  ;;  %s114_s11 = sadd.s32 %s1751_s13, %s112_s9 }
  0x2d   : > { %s296_s14 = smul.u32 %s2947_s27, %s2943_s26  ;;  %s115_s6 = ssub.s32 %s2398_s8, %s114_s11 }
  0x2e   : > { %p2440_p9 = por %p2429_p8, %p288_p7  ;;  %p116_p10 = scmp.eq.s32.totalorder %s115_s6, 0 }
  0x2f   : > { %s298_s25 = ssub.s32 %s295_s12, %s296_s14  ;;  %s302_s16 = sadd.s32 1, %s2209_s15 }
  0x30   : > { %p300_p11 = scmp.eq.s32.totalorder %s298_s25, 0  ;;  %p312_p12 = scmp.ne.s32.totalorder %s2209_s15, %s2205_s30 }
  0x31   : > { %s2446_s1 = scalar_select %p116_p10, %s2221_s18, %s118_s24  }
  0x32   : > { %s2449_s7 = scalar_select %p300_p11, %s2209_s15, %s302_s16  }
  0x33   : > { %2902 = sst [smem:[#allocation29_spill]] %s2446_s1  ;;  %p318_p13 = scmp.ne.s32.totalorder %s2205_s30, %s2201_s29 }
  0x34   : > { %2903 = sst [smem:[#allocation30_spill]] %s2449_s7  ;;  %p2457_p0 = por %p312_p12, %p2406_p4 }
  0x35   : > { %p2463_p1 = por %p318_p13, %p2429_p8  ;;  %p1759_p2 = scmp.ge.s32.totalorder %s2241_s23, 6 }
  0x37   : > { %s2905_s11 = scalar_select %p2463_p1, 1, 0 }
  0x38   : > { %499 = sbr.rel (%p1759_p2) target bundleno = 75 (0x4b), region = 40 }
  0x39   : > { %2906 = sst [smem:[#allocation31_spill]] %s2905_s11 }
  0x3d   : > { %502 = sbr.rel (!%p2412_p5) target bundleno = 75 (0x4b), region = 44  ;;  %s504_s6 = sand.u32 (%p2412_p5), 1, %s2221_s18  }
  0x3e   : > { %s1762_s12 = sshll.u32 (%p2412_p5), %s2398_s8, 2  ;;  %s1760_s13 = sshll.u32 (%p2412_p5), %s504_s6, 4 }
  0x3f   : > { %s2907_s2 = sld [smem:[#allocation34_spill]] (%p2412_p5)  ;;  %s506_s5 = scalar_lea.vmem (%p2412_p5), [#allocation7], %s1760_s13 }
  0x45   : > { %s512_s24 = scalar_lea.vmem %s2907_s2, %s1762_s12 }
  0x46   : > { %v529_v0 = vld [vmem:[%s512_s24] sm:$0xf]  ;;  %v531_v1 = vld [vmem:[%s512_s24 + $0xc] sm:$0xf]  ;;  %v533_v2 = vld [vmem:[%s512_s24 + $0x18] sm:$0xf] }
  0x47   : > { %530 = vst [vmem:[%s506_s5] sm:$0xf] %v529_v0  ;;  %v535_v3 = vld [vmem:[%s512_s24 + $0x24] sm:$0xf] }
  0x48   : > { %532 = vst [vmem:[%s506_s5 + $0x4] sm:$0xf] %v531_v1 }
  0x49   : > { %534 = vst [vmem:[%s506_s5 + $0x8] sm:$0xf] %v533_v2 }
  0x4a   : > { %536 = vst [vmem:[%s506_s5 + $0xc] sm:$0xf] %v535_v3 }
  0x4b PF: > { %p1763_p3 = scmp.ge.s32.totalorder %s2241_s23, 1  ;;  %p581_p5 = scmp.lt.s32.totalorder %s2241_s23, 7 }
  0x4d   : > { %p582_p7 = pnand %p1763_p3, %p581_p5 }
  0x4e   : > { %s2478_s8 = sand.u32 (!%p582_p7), 1, %s2217_s17   ;;  %s642_s10 = sand.u32 (!%p582_p7), 1, %s2205_s30  }
  0x4f   : > { %585 = sbr.rel (%p582_p7) target bundleno = 2115 (0x843), region = 89  ;;  %s2908_s0 = sld [smem:[#allocation32_spill]] (!%p582_p7) }
  0x50   : > { %s1764_s13 = sshll.u32 (!%p582_p7), %s2478_s8, 4  ;;  %s1765_s29 = sshll.u32 (!%p582_p7), %s2478_s8, 1 }
  0x51   : > { %s1766_s16 = sshll.u32 (!%p582_p7), %s642_s10, 1  ;;  %s686_s24 = ssub.s32 (!%p582_p7), 1, %s2229_s20 }
  0x52   : > { %s687_s5 = smul.u32 (!%p582_p7), %s2225_s19, %s686_s24  ;;  %s1768_s2 = sshll.u32 (!%p582_p7), %s2229_s20, 1 }
  0x53   : > { %s1769_s27 = sshll.u32 (!%p582_p7), %s2225_s19, 7  ;;  %s2909_s3 = sld [smem:[#allocation35_spill]] (!%p582_p7) }
  0x54   : > { %v723_v6 = vlaneseq  ;;  %s2500_s26 = sadd.s32 %s1768_s2, %s687_s5  ;;  %s2507_s22 = scalar_lea.vmem [#allocation8], %s1765_s29 }
  0x55   : > { %v2484_v4 = vld [vmem:[%s2908_s0] sm:$0xff]  ;;  %v2489_v5 = vld [vmem:[%s2908_s0 + $0x8] sm:$0xff]  ;;  %p690_p8 = scmp.lt.s32.totalorder %s2500_s26, 2  ;;  %s590_s0 = scalar_lea.vmem [#allocation7], %s1764_s13 }
  0x56   : > { %v2494_v7 = vand.u32 127, %v723_v6  ;;  %s2509_s21 = scalar_lea.vmem [#allocation10], %s1766_s16  ;;  %s2511_s10 = scalar_lea.vmem [#allocation12], %s1766_s16 }
  0x57   : > { %s691_s14 = scalar_select %p690_p8, %s2500_s26, 2 }
  0x58   : > { %p1770_p10 = scmp.ne.s32.totalorder %s2229_s20, 0 }
  0x59   : > { %s692_s12 = scalar_lea.vmem %s2909_s3, %s691_s14  ;;  %s2910_s5 = sld [smem:[#allocation33_spill]] (!%p1770_p10) }
  0x5a   : > { %729 = sbr.rel (%p1770_p10) target bundleno = 240 (0xf0), region = 97  ;;  %s1784_s13 = sshll.u32 (!%p1770_p10), %s2225_s19, 4 }
  0x5b   : > { %s776_s29 = scalar_lea.vmem (!%p1770_p10), [#allocation6], %s1784_s13 }
  0x5f   : > { %v1827_v8 = vld [vmem:[%s590_s0 + $0x8] sm:$0xff]  ;;  %v1826_v9 = vld [vmem:[%s590_s0] sm:$0xff]  ;;  %vm757_vm0 = vcmask 261120  }
  0x60   : > { %767 = vmatpush.bf16.msra.mxu0 %v1827_v8  ;;  %v1825_v10 = vld [vmem:[%s2910_s5] sm:$0xff] }
  0x61   : > { %v1968_v11 = vld [vmem:[%s692_s12] ss:$0 sm:$0xff] }
  0x64   : > { %768 = vmatpush.bf16.msra.mxu0 %v1826_v9 }
  0x67   : > { %1783 = vmatmul.msk.bf16.vlgmr.msra.gmra.mxu0 %vm757_vm0, %v1825_v10 }
  0xe4   : > { %v770_v12 = vpop.f32.mrf.mxu0 }
  0xe5   : > { %v771_v13 = vadd.f32 %v1968_v11, %v770_v12 }
  0xe7   : > { %777 = vst [vmem:[%s776_s29] sm:$0xff] %v771_v13 }
  0xec   : > { %v772_v14 = vpop.f32.mrf.mxu0 }
  0xed   : > { %v773_v15 = vadd.f32 %v1968_v11, %v772_v14 }
  0xef   : > { %778 = vst [vmem:[%s776_s29 + $0x8] sm:$0xff] %v773_v15 }
  0xf0 PF: > { %s1785_s16 = sshll.u32 %s2225_s19, 4  ;;  %p1787_p11 = scmp.ne.s32.totalorder (!%p1770_p10), %s2225_s19, 0 }
  0xf1   : > { %s780_s0 = scalar_lea.vmem [#allocation6], %s1785_s16 }
  0xf2   : > { %785 = sbr.rel (%p1770_p10) target bundleno = 1730 (0x6c2), region = 101 }
  0xf6   : > { %v2521_v16 = vld [vmem:[%s780_s0] sm:$0xff]  ;;  %v2523_v17 = vld [vmem:[%s780_s0 + $0x8] sm:$0xff] }
  0xf7   : > { %789 = sbr.rel (%p1787_p11) target bundleno = 261 (0x105), region = 105 }
  0xfc   : > { %vm790_vm1 = vcmask 15360   ;;  %v2243_v18 = vmov -inf   ;;  %vm795_vm2 = vcmask 7168   ;;  %v2244_v19 = vmov 0  }
  0xfd   : > { %791 = vst.msk [vmem:[#allocation2] sm:$0xff] %vm790_vm1, %v2243_v18  ;;  %v2245_v20 = vmov 0.0  }
  0xfe   : > { %792 = vst.msk [vmem:[#allocation2 + $0x8] sm:$0xff] %vm790_vm1, %v2243_v18 }
  0xff   : > { %793 = vst.msk [vmem:[#allocation3] sm:$0xff] %vm790_vm1, %v2244_v19 }
 0x100   : > { %794 = vst.msk [vmem:[#allocation3 + $0x8] sm:$0xff] %vm790_vm1, %v2244_v19 }
 0x101   : > { %796 = vst.msk [vmem:[#allocation4] sm:$0xff] %vm795_vm2, %v2243_v18 }
 0x102   : > { %797 = vst.msk [vmem:[#allocation4 + $0x8] sm:$0xff] %vm795_vm2, %v2243_v18 }
 0x103   : > { %798 = vst.msk [vmem:[#allocation5] sm:$0xff] %vm795_vm2, %v2245_v20 }
 0x104   : > { %799 = vst.msk [vmem:[#allocation5 + $0x8] sm:$0xff] %vm795_vm2, %v2245_v20 }
 0x105 PF: > { %v2246_v21 = vmov 0   ;;  %v845_v22 = vmax.f32 %v2521_v16, 0.0  ;;  %v846_v24 = vmax.f32 %v2523_v17, 0.0  ;;  %vm974_vm14 = vcmask 15360  }
 0x106   : > { %1969 = vset.pattern.permute.xlu0 %v2246_v21  ;;  %1970 = vset.pattern.permute.xlu2 %v2246_v21  ;;  %vm977_vm15 = vcmask 23552   ;;  %vm986_vm0 = vcmask 31744  }
 0x107   : > { %867 = vperm.xlu0 %1969, %v2484_v4   ;;  %v847_v23 = vadd.f32 1.0, %v845_v22  ;;  %v850_v25 = vmul.f32 -0.5, %v845_v22  ;;  %v856_v26 = vadd.f32 1.0, %v846_v24  ;;  %v853_v29 = vand.u32 2147483647, %v845_v22 }
 0x108   : > { %v859_v32 = vmul.f32 -0.5, %v846_v24  ;;  %v862_v36 = vand.u32 2147483647, %v846_v24 }
 0x109   : > { %1971 = vlog2.f32 %v847_v23  ;;  %v851_v27 = vadd.f32 1.0, %v850_v25  ;;  %vm854_vm3 = vcmp.lt.f32.partialorder %v853_v29, 0.0004427343 }
 0x10a   : > { %1973 = vlog2.f32 %v856_v26  ;;  %v860_v34 = vadd.f32 1.0, %v859_v32  ;;  %vm863_vm4 = vcmp.lt.f32.partialorder %v862_v36, 0.0004427343 }
 0x10b   : > { %v852_v31 = vmul.f32 %v851_v27, %v845_v22 }
 0x10c   : > { %v861_v40 = vmul.f32 %v860_v34, %v846_v24 }
 0x10f   : > { %872 = vperm.xlu0 %1969, %v2489_v5   ;;  %v1972_v28 = vpop.eup %1971 }
 0x110   : > { %v849_v30 = vmul.f32 0.6931472, %v1972_v28  ;;  %v1974_v35 = vpop.eup %1973 }
 0x111   : > { %v858_v39 = vmul.f32 0.6931472, %v1974_v35 }
 0x112   : > { %v855_v33 = vsel %vm854_vm3, %v852_v31, %v849_v30 }
 0x113   : > { %v864_v43 = vsel %vm863_vm4, %v861_v40, %v858_v39 }
 0x179   : > { %v868_v37 = vpop.permute.xlu0 %867 }
 0x17a   : > { %v875_v38 = vmul.f32 %v868_v37, %v855_v33 }
 0x17c   : > { %v877_v41 = vrot.slane %v875_v38, 4  ;;  %891 = vmax.xlane.f32.xlu1 %v875_v38 }
 0x17e   : > { %v878_v42 = vmax.f32 %v875_v38, %v877_v41 }
 0x180   : > { %v879_v44 = vrot.slane %v878_v42, 2 }
 0x181   : > { %v873_v45 = vpop.permute.xlu0 %872 }
 0x182   : > { %v880_v46 = vmax.f32 %v878_v42, %v879_v44  ;;  %v876_v47 = vmul.f32 %v873_v45, %v864_v43 }
 0x184   : > { %v881_v48 = vrot.slane %v880_v46, 1  ;;  %v883_v49 = vrot.slane %v876_v47, 4  ;;  %893 = vmax.xlane.f32.xlu1 %v876_v47 }
 0x186   : > { %v882_v50 = vmax.f32 %v880_v46, %v881_v48  ;;  %v884_v51 = vmax.f32 %v876_v47, %v883_v49  ;;  %v973_v46 = vld [vmem:[#allocation2 + $0x8] sm:$0xff] }
 0x188   : > { %889 = vst [vmem:[%s2507_s22] sm:$0x1] %v882_v50  ;;  %v885_v52 = vrot.slane %v884_v51, 2 }
 0x18a   : > { %v886_v53 = vmax.f32 %v884_v51, %v885_v52  ;;  %v927_v52 = vstv %s1769_s27 }
 0x18c   : > { %v887_v54 = vrot.slane %v886_v53, 1 }
 0x18e   : > { %v888_v55 = vmax.f32 %v886_v53, %v887_v54 }
 0x190   : > { %890 = vst [vmem:[%s2507_s22 + $0x1] sm:$0x1] %v888_v55 }
 0x1ef   : > { %v2534_v56 = vpop.xlane.xlu1 %891 }
 0x1f0   : > { %vm895_vm5 = vcmp.ge.f32.partialorder %v875_v38, %v2534_v56 }
 0x1f1   : > { %v897_v57 = vsel %vm895_vm5, %v2494_v7, 2147483647 }
 0x1f2   : > { %v900_v58 = vshra.s32 %v897_v57, 16  ;;  %v899_v0 = vand.u32 65535, %v897_v57 }
 0x1f4   : > { %v902_v59 = vcvt.s32.f32 %v900_v58  ;;  %v901_v2 = vcvt.s32.f32 %v899_v0 }
 0x1f6   : > { %903 = vmin.xlane.f32.xlu2 %v902_v59 }
 0x1f7   : > { %v2538_v60 = vpop.xlane.xlu1 %893 }
 0x1f8   : > { %vm896_vm6 = vcmp.ge.f32.partialorder %v876_v47, %v2538_v60 }
 0x1f9   : > { %v898_v61 = vsel %vm896_vm6, %v2494_v7, 2147483647  ;;  %vm840_vm6 = vcmask 7168  }
 0x1fa   : > { %v914_v62 = vshra.s32 %v898_v61, 16  ;;  %v913_v8 = vand.u32 65535, %v898_v61 }
 0x1fc   : > { %v916_v63 = vcvt.s32.f32 %v914_v62  ;;  %v915_v10 = vcvt.s32.f32 %v913_v8 }
 0x1fe   : > { %917 = vmin.xlane.f32.xlu2 %v916_v63 }
 0x269   : > { %v904_v1 = vpop.xlane.xlu2 %903 }
 0x26a   : > { %vm905_vm7 = vcmp.eq.f32.partialorder %v902_v59, %v904_v1  ;;  %v910_v12 = vcvt.f32.s32 %v904_v1  ;;  %v980_v59 = vld [vmem:[#allocation3] sm:$0xff] }
 0x26b   : > { %v906_v3 = vsel %vm905_vm7, %v901_v2, inf }
 0x26c   : > { %907 = vmin.xlane.f32.xlu0 %v906_v3  ;;  %v911_v14 = vshll.u32 %v910_v12, 16  ;;  %v981_v12 = vld [vmem:[#allocation3 + $0x8] sm:$0xff] }
 0x271   : > { %v918_v9 = vpop.xlane.xlu2 %917 }
 0x272   : > { %vm919_vm8 = vcmp.eq.f32.partialorder %v916_v63, %v918_v9  ;;  %v924_v19 = vcvt.f32.s32 %v918_v9 }
 0x273   : > { %v920_v11 = vsel %vm919_vm8, %v915_v10, inf }
 0x274   : > { %921 = vmin.xlane.f32.xlu1 %v920_v11  ;;  %v925_v22 = vshll.u32 %v924_v19, 16 }
 0x2df   : > { %v908_v13 = vpop.xlane.xlu0 %907 }
 0x2e0   : > { %v909_v15 = vcvt.f32.s32 %v908_v13 }
 0x2e2   : > { %v912_v18 = vadd.s32 %v911_v14, %v909_v15 }
 0x2e4   : > { %vm930_vm9 = vcmp.eq.s32.totalorder %v2494_v7, %v912_v18 }
 0x2e5   : > { %v932_v20 = vsel %vm930_vm9, -inf, %v875_v38  ;;  %v972_v38 = vld [vmem:[#allocation2] sm:$0xff] }
 0x2e6   : > { %934 = vmax.xlane.f32.xlu2 %v932_v20  ;;  %v975_v40 = vsel %vm974_vm14, %v972_v38, %v2534_v56  ;;  %v928_v56 = vadd.s32 %v927_v52, %v912_v18 }
 0x2e7   : > { %v922_v21 = vpop.xlane.xlu1 %921 }
 0x2e8   : > { %v923_v23 = vcvt.f32.s32 %v922_v21  ;;  %v982_v62 = vsel %vm974_vm14, %v980_v59, %v928_v56 }
 0x2ea   : > { %v926_v24 = vadd.s32 %v925_v22, %v923_v23 }
 0x2ec   : > { %vm931_vm10 = vcmp.eq.s32.totalorder %v2494_v7, %v926_v24  ;;  %v929_v9 = vadd.s32 %v927_v52, %v926_v24 }
 0x2ed   : > { %v933_v25 = vsel %vm931_vm10, -inf, %v876_v47  ;;  %v976_v47 = vsel %vm974_vm14, %v973_v46, %v2538_v60 }
 0x2ee   : > { %936 = vmax.xlane.f32.xlu1 %v933_v25  ;;  %v983_v15 = vsel %vm974_vm14, %v981_v12, %v929_v9 }
 0x359   : > { %v935_v26 = vpop.xlane.xlu2 %934 }
 0x35a   : > { %vm938_vm11 = vcmp.ge.f32.partialorder %v932_v20, %v935_v26  ;;  %v2549_v41 = vsel %vm977_vm15, %v975_v40, %v935_v26 }
 0x35b   : > { %v940_v27 = vsel %vm938_vm11, %v2494_v7, 2147483647  ;;  %v987_v45 = vsel %vm986_vm0, %v2549_v41, -inf }
 0x35c   : > { %v943_v28 = vshra.s32 %v940_v27, 16  ;;  %v942_v34 = vand.u32 65535, %v940_v27 }
 0x35e   : > { %v945_v29 = vcvt.s32.f32 %v943_v28  ;;  %v944_v36 = vcvt.s32.f32 %v942_v34 }
 0x360   : > { %946 = vmin.xlane.f32.xlu2 %v945_v29 }
 0x361   : > { %v937_v30 = vpop.xlane.xlu1 %936 }
 0x362   : > { %vm939_vm12 = vcmp.ge.f32.partialorder %v933_v25, %v937_v30  ;;  %v2556_v48 = vsel %vm977_vm15, %v976_v47, %v937_v30 }
 0x363   : > { %v941_v31 = vsel %vm939_vm12, %v2494_v7, 2147483647  ;;  %v990_v49 = vsel %vm986_vm0, %v2556_v48, -inf }
 0x364   : > { %v957_v32 = vshra.s32 %v941_v31, 16  ;;  %v956_v39 = vand.u32 65535, %v941_v31  ;;  %v800_v31 = vld [vmem:[#allocation4] sm:$0xff] }
 0x366   : > { %v959_v33 = vcvt.s32.f32 %v957_v32  ;;  %v958_v43 = vcvt.s32.f32 %v956_v39 }
 0x368   : > { %960 = vmin.xlane.f32.xlu1 %v959_v33 }
 0x3d3   : > { %v947_v35 = vpop.xlane.xlu2 %946 }
 0x3d4   : > { %vm948_vm13 = vcmp.eq.f32.partialorder %v945_v29, %v947_v35  ;;  %v953_v50 = vcvt.f32.s32 %v947_v35 }
 0x3d5   : > { %v949_v37 = vsel %vm948_vm13, %v944_v36, inf }
 0x3d6   : > { %950 = vmin.xlane.f32.xlu2 %v949_v37  ;;  %v954_v53 = vshll.u32 %v953_v50, 16 }
 0x3db   : > { %v961_v42 = vpop.xlane.xlu1 %960 }
 0x3dc   : > { %vm962_vm1 = vcmp.eq.f32.partialorder %v959_v33, %v961_v42  ;;  %v967_v57 = vcvt.f32.s32 %v961_v42 }
 0x3dd   : > { %v963_v44 = vsel %vm962_vm1, %v958_v43, inf  ;;  %v2590_v43 = vld [vmem:[#allocation4 + $0x8] sm:$0xff] }
 0x3de   : > { %964 = vmin.xlane.f32.xlu1 %v963_v44  ;;  %988 = vmax.xlane.f32.xlu2 %v987_v45  ;;  %v968_v63 = vshll.u32 %v967_v57, 16 }
 0x3e6   : > { %991 = vmax.xlane.f32.xlu1 %v990_v49 }
 0x449   : > { %v951_v51 = vpop.xlane.xlu2 %950 }
 0x44a   : > { %v952_v54 = vcvt.f32.s32 %v951_v51 }
 0x44c   : > { %v955_v55 = vadd.s32 %v954_v53, %v952_v54 }
 0x44e   : > { %v970_v58 = vadd.s32 %v955_v55, %v927_v52 }
 0x450   : > { %v2566_v1 = vsel %vm977_vm15, %v982_v62, %v970_v58 }
 0x451   : > { %v965_v61 = vpop.xlane.xlu1 %964  ;;  %v2562_v60 = vpop.xlane.xlu2 %988 }
 0x452   : > { %v966_v0 = vcvt.f32.s32 %v965_v61  ;;  %vm993_vm2 = vcmp.ge.f32.partialorder %v2549_v41, %v2562_v60 }
 0x453   : > { %v995_v2 = vsel %vm993_vm2, %v2566_v1, 2147483647 }
 0x454   : > { %v969_v3 = vadd.s32 %v968_v63, %v966_v0  ;;  %v997_v8 = vsel %vm986_vm0, %v995_v2, 2147483647 }
 0x455   : > { %v999_v10 = vshra.s32 %v997_v8, 16  ;;  %v998_v23 = vand.u32 65535, %v997_v8 }
 0x456   : > { %v971_v11 = vadd.s32 %v969_v3, %v927_v52 }
 0x457   : > { %v1001_v13 = vcvt.s32.f32 %v999_v10  ;;  %v1000_v25 = vcvt.s32.f32 %v998_v23 }
 0x458   : > { %v2576_v18 = vsel %vm977_vm15, %v983_v15, %v971_v11  ;;  %v808_v11 = vld [vmem:[#allocation5] sm:$0xff] }
 0x459   : > { %v2572_v14 = vpop.xlane.xlu1 %991  ;;  %1002 = vmin.xlane.f32.xlu2 %v1001_v13 }
 0x45a   : > { %vm994_vm3 = vcmp.ge.f32.partialorder %v2556_v48, %v2572_v14 }
 0x45b   : > { %v996_v19 = vsel %vm994_vm3, %v2576_v18, 2147483647 }
 0x45c   : > { %v1012_v20 = vsel %vm986_vm0, %v996_v19, 2147483647 }
 0x45d   : > { %v1014_v21 = vshra.s32 %v1012_v20, 16  ;;  %v1013_v27 = vand.u32 65535, %v1012_v20 }
 0x45f   : > { %v1016_v22 = vcvt.s32.f32 %v1014_v21  ;;  %v1015_v29 = vcvt.s32.f32 %v1013_v27 }
 0x461   : > { %1017 = vmin.xlane.f32.xlu1 %v1016_v22 }
 0x469   : > { %802 = vmax.xlane.f32.xlu1 %v2521_v16 }
 0x4cc   : > { %v1003_v24 = vpop.xlane.xlu2 %1002 }
 0x4cd   : > { %vm1004_vm4 = vcmp.eq.f32.partialorder %v1001_v13, %v1003_v24  ;;  %v1009_v35 = vcvt.f32.s32 %v1003_v24 }
 0x4ce   : > { %v1005_v26 = vsel %vm1004_vm4, %v1000_v25, inf }
 0x4cf   : > { %1006 = vmin.xlane.f32.xlu2 %v1005_v26  ;;  %v1010_v37 = vshll.u32 %v1009_v35, 16 }
 0x4d4   : > { %v1018_v28 = vpop.xlane.xlu1 %1017 }
 0x4d5   : > { %vm1019_vm5 = vcmp.eq.f32.partialorder %v1016_v22, %v1018_v28  ;;  %v1024_v40 = vcvt.f32.s32 %v1018_v28 }
 0x4d6   : > { %v1020_v30 = vsel %vm1019_vm5, %v1015_v29, inf }
 0x4d7   : > { %1021 = vmin.xlane.f32.xlu0 %v1020_v30  ;;  %804 = vmax.xlane.f32.xlu2 %v2523_v17  ;;  %v1025_v47 = vshll.u32 %v1024_v40, 16 }
 0x4dc   : > { %v803_v32 = vpop.xlane.xlu1 %802 }
 0x4dd   : > { %v806_v33 = vmax.f32 %v800_v31, %v803_v32 }
 0x4df   : > { %v810_v34 = vsub.f32 %v800_v31, %v806_v33  ;;  %843 = vst.msk [vmem:[#allocation4] sm:$0xff] %vm840_vm6, %v806_v33 }
 0x4e1   : > { %v812_v63 = vmul.f32 1.442695, %v810_v34 }
 0x4ef   : > { %820 = vperm.xlu2 %1970, %v806_v33  }
 0x542   : > { %v1007_v36 = vpop.xlane.xlu2 %1006 }
 0x543   : > { %v1008_v38 = vcvt.f32.s32 %v1007_v36 }
 0x545   : > { %v2585_v39 = vadd.s32 %v1010_v37, %v1008_v38 }
 0x547   : > { %vm1027_vm7 = vcmp.eq.s32.totalorder %v2566_v1, %v2585_v39 }
 0x548   : > { %v1029_v42 = vsel %vm1027_vm7, -inf, %v2549_v41 }
 0x549   : > { %v1031_v44 = vsel %vm986_vm0, %v1029_v42, -inf }
 0x54a   : > { %1032 = vmax.xlane.f32.xlu0 %v1031_v44  ;;  %v805_v45 = vpop.xlane.xlu2 %804  ;;  %v1022_v46 = vpop.xlane.xlu0 %1021  ;;  %v809_v44 = vld [vmem:[#allocation5 + $0x8] sm:$0xff] }
 0x54b   : > { %v2594_v49 = vmax.f32 %v2590_v43, %v805_v45  ;;  %v1023_v50 = vcvt.f32.s32 %v1022_v46 }
 0x54d   : > { %v811_v51 = vsub.f32 %v2590_v43, %v2594_v49  ;;  %844 = vst.msk [vmem:[#allocation4 + $0x8] sm:$0xff] %vm840_vm6, %v2594_v49  ;;  %v2600_v52 = vadd.s32 %v1025_v47, %v1023_v50 }
 0x54f   : > { %vm1028_vm8 = vcmp.eq.s32.totalorder %v2576_v18, %v2600_v52  ;;  %v814_v33 = vmul.f32 1.442695, %v811_v51 }
 0x550   : > { %v1030_v41 = vsel %vm1028_vm8, -inf, %v2556_v48 }
 0x551   : > { %v1034_v53 = vsel %vm986_vm0, %v1030_v41, -inf }
 0x552   : > { %1035 = vmax.xlane.f32.xlu1 %v1034_v53  ;;  %v821_v54 = vpop.permute.xlu2 %820 }
 0x553   : > { %v828_v55 = vsub.f32 %v2521_v16, %v821_v54 }
 0x555   : > { %v830_v56 = vmul.f32 1.442695, %v828_v55 }
 0x557   : > { %1975 = vpow2.f32 %v830_v56 }
 0x558   : > { %1977 = vpow2.f32 %v812_v63 }
 0x55d   : > { %v1976_v57 = vpop.eup %1975 }
 0x55e   : > { %825 = vperm.xlu0 %1969, %v2594_v49   ;;  %834 = vadd.xlane.f32.xlu2 %v1976_v57  ;;  %v1978_v10 = vpop.eup %1977 }
 0x55f   : > { %v816_v12 = vmul.f32 %v1978_v10, %v808_v11 }
 0x5bd   : > { %v1033_v58 = vpop.xlane.xlu0 %1032 }
 0x5be   : > { %vm1037_vm9 = vcmp.ge.f32.partialorder %v1029_v42, %v1033_v58  ;;  %v1071_v59 = vsel %vm840_vm6, %v2562_v60, %v1033_v58 }
 0x5bf   : > { %v1039_v61 = vsel %vm1037_vm9, %v2566_v1, 2147483647  ;;  %1073 = vst.msk [vmem:[#allocation2] sm:$0xff] %vm974_vm14, %v1071_v59 }
 0x5c0   : > { %v1041_v48 = vsel %vm986_vm0, %v1039_v61, 2147483647 }
 0x5c1   : > { %v1043_v62 = vshra.s32 %v1041_v48, 16  ;;  %v1042_v19 = vand.u32 65535, %v1041_v48 }
 0x5c3   : > { %v1045_v0 = vcvt.s32.f32 %v1043_v62 }
 0x5c5   : > { %v1036_v2 = vpop.xlane.xlu1 %1035  ;;  %1046 = vmin.xlane.f32.xlu1 %v1045_v0 }
 0x5c6   : > { %vm1038_vm10 = vcmp.ge.f32.partialorder %v1030_v41, %v1036_v2  ;;  %v1072_v3 = vsel %vm840_vm6, %v2572_v14, %v1036_v2  ;;  %v1044_v14 = vcvt.s32.f32 %v1042_v19 }
 0x5c7   : > { %v1040_v8 = vsel %vm1038_vm10, %v2576_v18, 2147483647  ;;  %1074 = vst.msk [vmem:[#allocation2 + $0x8] sm:$0xff] %vm974_vm14, %v1072_v3 }
 0x5c8   : > { %v1056_v60 = vsel %vm986_vm0, %v1040_v8, 2147483647 }
 0x5c9   : > { %v1058_v1 = vshra.s32 %v1056_v60, 16  ;;  %v1057_v23 = vand.u32 65535, %v1056_v60 }
 0x5cb   : > { %v1060_v9 = vcvt.s32.f32 %v1058_v1  ;;  %v1059_v26 = vcvt.s32.f32 %v1057_v23 }
 0x5cd   : > { %1061 = vmin.xlane.f32.xlu1 %v1060_v9 }
 0x5d0   : > { %v826_v21 = vpop.permute.xlu0 %825 }
 0x5d1   : > { %v835_v13 = vpop.xlane.xlu2 %834  ;;  %v829_v22 = vsub.f32 %v2523_v17, %v826_v21 }
 0x5d2   : > { %v838_v15 = vadd.f32 %v835_v13, %v816_v12 }
 0x5d3   : > { %v832_v24 = vmul.f32 1.442695, %v829_v22 }
 0x5d4   : > { %841 = vst.msk [vmem:[#allocation5] sm:$0xff] %vm840_vm6, %v838_v15 }
 0x5d5   : > { %1979 = vpow2.f32 %v832_v24 }
 0x5d6   : > { %1981 = vpow2.f32 %v814_v33 }
 0x5db   : > { %v1980_v28 = vpop.eup %1979 }
 0x5dc   : > { %v1982_v43 = vpop.eup %1981 }
 0x5dd   : > { %v817_v46 = vmul.f32 %v1982_v43, %v809_v44 }
 0x638   : > { %v1047_v20 = vpop.xlane.xlu1 %1046 }
 0x639   : > { %vm1048_vm11 = vcmp.eq.f32.partialorder %v1045_v0, %v1047_v20  ;;  %v1053_v29 = vcvt.f32.s32 %v1047_v20 }
 0x63a   : > { %v1049_v18 = vsel %vm1048_vm11, %v1044_v14, inf }
 0x63b   : > { %1050 = vmin.xlane.f32.xlu0 %v1049_v18  ;;  %v1054_v31 = vshll.u32 %v1053_v29, 16 }
 0x640   : > { %v1062_v25 = vpop.xlane.xlu1 %1061 }
 0x641   : > { %vm1063_vm12 = vcmp.eq.f32.partialorder %v1060_v9, %v1062_v25  ;;  %v1068_v35 = vcvt.f32.s32 %v1062_v25 }
 0x642   : > { %v1064_v27 = vsel %vm1063_vm12, %v1059_v26, inf }
 0x643   : > { %1065 = vmin.xlane.f32.xlu1 %v1064_v27  ;;  %v1069_v38 = vshll.u32 %v1068_v35, 16 }
 0x64b   : > { %836 = vadd.xlane.f32.xlu1 %v1980_v28 }
 0x6ae   : > { %v1051_v30 = vpop.xlane.xlu0 %1050 }
 0x6af   : > { %v1052_v32 = vcvt.f32.s32 %v1051_v30 }
 0x6b1   : > { %v1055_v34 = vadd.s32 %v1054_v31, %v1052_v32 }
 0x6b3   : > { %v1075_v36 = vsel %vm840_vm6, %v2585_v39, %v1055_v34 }
 0x6b4   : > { %1077 = vst.msk [vmem:[#allocation3] sm:$0xff] %vm974_vm14, %v1075_v36 }
 0x6b6   : > { %v1066_v37 = vpop.xlane.xlu1 %1065 }
 0x6b7   : > { %v1067_v40 = vcvt.f32.s32 %v1066_v37 }
 0x6b9   : > { %v1070_v42 = vadd.s32 %v1069_v38, %v1067_v40 }
 0x6bb   : > { %v1076_v45 = vsel %vm840_vm6, %v2600_v52, %v1070_v42 }
 0x6bc   : > { %1078 = vst.msk [vmem:[#allocation3 + $0x8] sm:$0xff] %vm974_vm14, %v1076_v45 }
 0x6be   : > { %v837_v47 = vpop.xlane.xlu1 %836 }
 0x6bf   : > { %v839_v49 = vadd.f32 %v837_v47, %v817_v46 }
 0x6c1   : > { %842 = vst.msk [vmem:[#allocation5 + $0x8] sm:$0xff] %vm840_vm6, %v839_v49 }
 0x6c2 PF: > { %p1788_p12 = scmp.ne.s32.totalorder %s2229_s20, 1 }
 0x6c3   : > { %p1790_p13 = scmp.ne.s32.totalorder (!%p1788_p12), %s2225_s19, 2 }
 0x6c4   : > { %1082 = sbr.rel (%p1788_p12) target bundleno = 2047 (0x7ff), region = 109 }
 0x6c9   : > { %v1088_v39 = vld [vmem:[#allocation4] sm:$0xff]  ;;  %v2628_v50 = vld [vmem:[#allocation3] sm:$0xff]  ;;  %v2630_v51 = vld [vmem:[#allocation3 + $0x8] sm:$0xff]  ;;  %v1170_v41 = vstv %s1769_s27  ;;  %v2247_v52 = vmov 0   ;;  %v2248_v2 = vmov 1   ;;  %v1084_v35 = vshrl.u32 %v723_v6, 7 }
 0x6ca   : > { %1983 = vset.pattern.permute.xlu0 %v2247_v52  ;;  %1984 = vset.pattern.permute.xlu1 %v2247_v52  ;;  %v1171_v53 = vsub.s32 %v2628_v50, %v1170_v41  ;;  %v1172_v54 = vsub.s32 %v2630_v51, %v1170_v41  ;;  %v1106_v55 = vld [vmem:[#allocation5] sm:$0xff]  ;;  %v2639_v56 = vld [vmem:[#allocation2] sm:$0xff]  ;;  %v1107_v57 = vld [vmem:[#allocation5 + $0x8] sm:$0xff]  ;;  %v2249_v43 = vmov 0.0   ;;  %s2911_s25 = sld [smem:[#allocation36_spill]] (!%p1790_p13) }
 0x6cb   : > { %1092 = vperm.xlu0 %1983, %v1088_v39   ;;  %1985 = vset.pattern.permute.xlu2 %v2247_v52  ;;  %1992 = vrcp.f32 %v1106_v55  ;;  %vm1173_vm13 = vcmp.gt.f32.partialorder %v2639_v56, 0.0  ;;  %v2642_v58 = vld [vmem:[#allocation2 + $0x8] sm:$0xff]  ;;  %vm1113_vm6 = vweird.f32 %v1106_v55  ;;  %v1119_v0 = vand.u32 2147483648, %v1106_v55  ;;  %s2912_s2 = sld [smem:[#allocation38_spill]] (!%p1790_p13) }
 0x6cc   : > { %1184 = vperm.xlu1 %1984, %v1171_v53   ;;  %1187 = vperm.xlu2 %1985, %v1172_v54   ;;  %vm1175_vm14 = vcmp.ge.s32.totalorder %v1171_v53, 0  ;;  %vm1177_vm15 = vcmp.lt.s32.totalorder %v1171_v53, 128  ;;  %1994 = vrcp.f32 %v1107_v57  ;;  %vm1176_vm0 = vcmp.ge.s32.totalorder %v1172_v54, 0  ;;  %v1089_v59 = vld [vmem:[#allocation4 + $0x8] sm:$0xff]  ;;  %s2913_s13 = sld [smem:[#allocation43_spill]] (!%p1790_p13) }
 0x6cd   : > { %vm1178_vm1 = vcmp.lt.s32.totalorder %v1172_v54, 128  ;;  %vm1179_vm2 = vmand %vm1175_vm14, %vm1177_vm15  ;;  %vm1174_vm4 = vcmp.gt.f32.partialorder %v2642_v58, 0.0  ;;  %v1117_v8 = vand.u32 2147483647, %v1106_v55  ;;  %v1120_v10 = vor.u32 1.1754944e-38, %v1119_v0  ;;  %s2914_s0 = sld [smem:[#allocation33_spill]] (!%p1790_p13) }
 0x6ce   : > { %vm1181_vm3 = vmand %vm1173_vm13, %vm1179_vm2  ;;  %vm1128_vm11 = vweird.f32 %v1107_v57  ;;  %v1134_v20 = vand.u32 2147483648, %v1107_v57  ;;  %v1132_v21 = vand.u32 2147483647, %v1107_v57  ;;  %vm1085_vm15 = vcmp.gt.s32.totalorder %v1084_v35, 0  ;;  %s2915_s29 = sld [smem:[#allocation44_spill]] (!%p1790_p13) }
 0x6cf   : > { %v1191_v48 = vsel %vm1181_vm3, 1, %v2247_v52  ;;  %vm1180_vm5 = vmand %vm1176_vm0, %vm1178_vm1  ;;  %vm1118_vm10 = vcmp.eq.f32.partialorder %v1117_v8, 8.507059e+37  ;;  %v1789_v44 = vsel %vm1085_vm15, 1.0, %v2249_v43  ;;  %s2917_s14 = sld [smem:[#allocation37_spill]] (!%p1790_p13) }
 0x6d0   : > { %vm1182_vm8 = vmand %vm1174_vm4, %vm1180_vm5  ;;  %v1135_v18 = vor.u32 1.1754944e-38, %v1134_v20  ;;  %vm1133_vm14 = vcmp.eq.f32.partialorder %v1132_v21, 8.507059e+37  ;;  %s2918_s24 = sld [smem:[#allocation39_spill]] (!%p1790_p13) }
 0x6d1   : > { %v1993_v61 = vpop.eup %1992  ;;  %v1192_v11 = vsel %vm1182_vm8, 1, %v2247_v52 }
 0x6d2   : > { %v1109_v62 = vmul.f32 %v1993_v61, %v1106_v55  ;;  %v1995_v63 = vpop.eup %1994  ;;  %vm1114_vm7 = vweird.f32 %v1993_v61 }
 0x6d3   : > { %1097 = vperm.xlu0 %1983, %v1089_v59   ;;  %v1124_v60 = vmul.f32 %v1995_v63, %v1107_v57  ;;  %vm1115_vm9 = vmor %vm1113_vm6, %vm1114_vm7  ;;  %vm1129_vm12 = vweird.f32 %v1995_v63 }
 0x6d4   : > { %1986 = vset.pattern.permute.xlu1 %v2248_v2  ;;  %v1110_v3 = vsub.f32 1.0, %v1109_v62  ;;  %1194 = vperm.xlu2 %1985, %v1191_v48   ;;  %vm1130_vm13 = vmor %vm1128_vm11, %vm1129_vm12 }
 0x6d5   : > { %1208 = vperm.xlu1 %1986, %v1171_v53   ;;  %v1125_v9 = vsub.f32 1.0, %v1124_v60 }
 0x6d6   : > { %v1111_v1 = vmul.f32 %v1993_v61, %v1110_v3 }
 0x6d7   : > { %v1126_v13 = vmul.f32 %v1995_v63, %v1125_v9 }
 0x6d8   : > { %v1112_v12 = vadd.f32 %v1993_v61, %v1111_v1 }
 0x6d9   : > { %v1127_v14 = vadd.f32 %v1995_v63, %v1126_v13 }
 0x6da   : > { %v1116_v15 = vsel %vm1115_vm9, %v1993_v61, %v1112_v12 }
 0x6db   : > { %1197 = vperm.xlu0 %1983, %v1192_v11   ;;  %v1121_v19 = vsel %vm1118_vm10, %v1120_v10, %v1116_v15  ;;  %v1131_v22 = vsel %vm1130_vm13, %v1995_v63, %v1127_v14 }
 0x6dc   : > { %1987 = vset.pattern.permute.xlu2 %v2248_v2  ;;  %v1136_v23 = vsel %vm1133_vm14, %v1135_v18, %v1131_v22 }
 0x6dd   : > { %1988 = vset.pattern.permute.xlu1 %v2247_v52  ;;  %1211 = vperm.xlu2 %1987, %v1172_v54  }
 0x6de   : > { %1140 = vperm.xlu1 %1988, %v1121_v19  }
 0x6e3   : > { %1989 = vset.pattern.permute.xlu0 %v2248_v2 }
 0x6e4   : > { %1216 = vperm.xlu0 %1989, %v1191_v48  }
 0x6e5   : > { %1991 = vset.pattern.permute.xlu2 %v2247_v52 }
 0x6e6   : > { %1990 = vset.pattern.permute.xlu1 %v2248_v2  ;;  %1145 = vperm.xlu2 %1991, %v1136_v23  }
 0x6e7   : > { %1219 = vperm.xlu1 %1990, %v1192_v11  }
 0x726   : > { %v1188_v24 = vpop.permute.xlu2 %1187 }
 0x727   : > { %vm1190_vm6 = vcmp.eq.s32.totalorder %v2494_v7, %v1188_v24 }
 0x72e   : > { %v1195_v25 = vpop.permute.xlu2 %1194 }
 0x72f   : > { %vm1199_vm1 = vcmp.eq.s32.totalorder %v1195_v25, 1 }
 0x737   : > { %v1212_v29 = vpop.permute.xlu2 %1211 }
 0x738   : > { %vm1214_vm9 = vcmp.eq.s32.totalorder %v2494_v7, %v1212_v29 }
 0x73d   : > { %v1093_v26 = vpop.permute.xlu0 %1092 }
 0x73e   : > { %v1185_v27 = vpop.permute.xlu1 %1184  ;;  %v1100_v28 = vsub.f32 %v2521_v16, %v1093_v26 }
 0x73f   : > { %vm1189_vm0 = vcmp.eq.s32.totalorder %v2494_v7, %v1185_v27 }
 0x740   : > { %v1102_v30 = vmul.f32 1.442695, %v1100_v28  ;;  %v1146_v37 = vpop.permute.xlu2 %1145  ;;  %vm1201_vm2 = vmand %vm1189_vm0, %vm1199_vm1 }
 0x741   : > { %v1203_v52 = vsel %vm1201_vm2, 1.0, %v2249_v43 }
 0x742   : > { %1996 = vpow2.f32 %v1102_v30 }
 0x745   : > { %v1098_v31 = vpop.permute.xlu0 %1097 }
 0x746   : > { %v1101_v32 = vsub.f32 %v2523_v17, %v1098_v31 }
 0x747   : > { %v1209_v33 = vpop.permute.xlu1 %1208 }
 0x748   : > { %v1104_v34 = vmul.f32 1.442695, %v1101_v32  ;;  %v1997_v38 = vpop.eup %1996  ;;  %vm1213_vm4 = vcmp.eq.s32.totalorder %v2494_v7, %v1209_v33 }
 0x74a   : > { %1998 = vpow2.f32 %v1104_v34 }
 0x74d   : > { %v1198_v36 = vpop.permute.xlu0 %1197 }
 0x74e   : > { %vm1200_vm3 = vcmp.eq.s32.totalorder %v1198_v36, 1 }
 0x74f   : > { %vm1202_vm8 = vmand %vm1190_vm6, %vm1200_vm3 }
 0x750   : > { %v1999_v40 = vpop.eup %1998  ;;  %v1141_v42 = vpop.permute.xlu1 %1140  ;;  %v1204_v62 = vsel %vm1202_vm8, 1.0, %v2249_v43 }
 0x751   : > { %v1148_v16 = vmul.f32 %v1997_v38, %v1141_v42  ;;  %v1149_v45 = vmul.f32 %v1999_v40, %v1146_v37 }
 0x753   : > { %v1150_v17 = vmul.f32 %v1789_v44, %v1148_v16  ;;  %v1151_v46 = vmul.f32 %v1789_v44, %v1149_v45 }
 0x755   : > { %v1152_v47 = vrot.slane %v1150_v17, 4  ;;  %v1158_v49 = vrot.slane %v1151_v46, 4 }
 0x756   : > { %v1217_v6 = vpop.permute.xlu0 %1216 }
 0x757   : > { %v1153_v39 = vadd.f32 %v1152_v47, %v1150_v17  ;;  %v1159_v41 = vadd.f32 %v1158_v49, %v1151_v46  ;;  %vm1221_vm5 = vcmp.eq.s32.totalorder %v1217_v6, 1 }
 0x758   : > { %vm1223_vm7 = vmand %vm1213_vm4, %vm1221_vm5 }
 0x759   : > { %v1154_v53 = vrot.slane %v1153_v39, 2  ;;  %v1160_v54 = vrot.slane %v1159_v41, 2  ;;  %v1225_v55 = vsel %vm1223_vm7, 1.0, %v2249_v43  ;;  %v1220_v57 = vpop.permute.xlu1 %1219 }
 0x75a   : > { %v1227_v59 = vadd.f32 %v1225_v55, %v1203_v52  ;;  %vm1222_vm10 = vcmp.eq.s32.totalorder %v1220_v57, 1 }
 0x75b   : > { %v1155_v61 = vadd.f32 %v1154_v53, %v1153_v39  ;;  %v1161_v48 = vadd.f32 %v1160_v54, %v1159_v41  ;;  %vm1224_vm11 = vmand %vm1214_vm9, %vm1222_vm10 }
 0x75c   : > { %v1229_v63 = vrot.slane %v1227_v59, 4  ;;  %v1226_v0 = vsel %vm1224_vm11, 1.0, %v2249_v43 }
 0x75d   : > { %v1156_v2 = vrot.slane %v1155_v61, 1  ;;  %v1162_v3 = vrot.slane %v1161_v48, 1  ;;  %v1228_v8 = vadd.f32 %v1226_v0, %v1204_v62 }
 0x75e   : > { %v1230_v60 = vadd.f32 %v1229_v63, %v1227_v59 }
 0x75f   : > { %v1157_v1 = vadd.f32 %v1156_v2, %v1155_v61  ;;  %v1163_v9 = vadd.f32 %v1162_v3, %v1161_v48  ;;  %v1235_v10 = vrot.slane %v1228_v8, 4 }
 0x760   : > { %v1231_v7 = vrot.slane %v1230_v60, 2 }
 0x761   : > { %1164 = vst [vmem:[%s2511_s10] sm:$0x1] %v1157_v1  ;;  %v1236_v11 = vadd.f32 %v1235_v10, %v1228_v8 }
 0x762   : > { %1165 = vst [vmem:[%s2511_s10 + $0x1] sm:$0x1] %v1163_v9  ;;  %v1232_v12 = vadd.f32 %v1231_v7, %v1230_v60 }
 0x763   : > { %v1237_v13 = vrot.slane %v1236_v11, 2 }
 0x764   : > { %v1233_v15 = vrot.slane %v1232_v12, 1 }
 0x765   : > { %v1238_v19 = vadd.f32 %v1237_v13, %v1236_v11 }
 0x766   : > { %v1234_v20 = vadd.f32 %v1233_v15, %v1232_v12 }
 0x767   : > { %v1239_v14 = vrot.slane %v1238_v19, 1  ;;  %1246 = sbr.rel (%p1790_p13) target bundleno = 2047 (0x7ff), region = 113 }
 0x768   : > { %1241 = vst [vmem:[%s2509_s21] sm:$0x1] %v1234_v20 }
 0x769   : > { %v1240_v21 = vadd.f32 %v1239_v14, %v1238_v19 }
 0x76b   : > { %1242 = vst [vmem:[%s2509_s21 + $0x1] sm:$0x1] %v1240_v21 }
 0x76c   : > { %vm1247_vm12 = vcmask 15360   ;;  %v1829_v18 = vld [vmem:[%s2911_s25 + $0x8] sm:$0xff]  ;;  %v1833_v23 = vld [vmem:[%s2914_s0] sm:$0xff]   ;;  %s2916_s0 = smov %s2915_s29  ;;  %v2250_v27 = vmov 0   ;;  %vm1325_vm13 = vcmask 1041409   ;;  %vm1279_vm14 = vcmask 261120  }
 0x76d   : > { %v1831_v22 = vld [vmem:[%s2912_s2 + $0x8] sm:$0xff]  ;;  %1248 = vst.msk [vmem:[%s2913_s13] sm:$0xff] %vm1247_vm12, %v2639_v56  ;;  %1289 = vmatpush.bf16.msra.mxu0 %v1829_v18  ;;  %v1828_v24 = vld [vmem:[%s2911_s25] sm:$0xff]  ;;  %v1834_v56 = vunpack.c.l.b16 %v1833_v23  ;;  %v1835_v26 = vunpack.c.h.b16 %v1833_v23  ;;  %2000 = vset.pattern.permute.xlu0 %v2250_v27  ;;  %vm1309_vm15 = vcmask 130048   ;;  %vm1359_vm0 = vcmask 122880  }
 0x76e   : > { %1249 = vst.msk [vmem:[%s2913_s13 + $0x8] sm:$0xff] %vm1247_vm12, %v2642_v58  ;;  %1349 = vmatpush.bf16.msra.mxu1 %v1831_v22  ;;  %v1830_v25 = vld [vmem:[%s2912_s2] sm:$0xff]  ;;  %1299 = vperm.xlu0 %2000, %v2484_v4  }
 0x76f   : > { %1250 = vst.msk [vmem:[%s2915_s29] sm:$0xff] %vm1247_vm12, %v2628_v50  ;;  %v1800_v58 = vunpack.i.l.s16 %v1834_v56  ;;  %v1801_v28 = vunpack.i.l.s16 %v1835_v26  ;;  %v2001_v50 = vld [vmem:[%s2917_s14] ss:$0 sm:$0xff] }
 0x770   : > { %1251 = vst.msk [vmem:[%s2916_s0 + $0x8] sm:$0xff] %vm1247_vm12, %v2630_v51  ;;  %v2002_v51 = vld [vmem:[%s2918_s24] ss:$0 sm:$0xff] }
 0x771   : > { %1290 = vmatpush.bf16.msra.mxu0 %v1828_v24  ;;  %v1324_v29 = vrot.slane %v1801_v28, 7 }
 0x772   : > { %1350 = vmatpush.bf16.msra.mxu1 %v1830_v25 }
 0x773   : > { %v1326_v30 = vsel %vm1325_vm13, %v1324_v29, %v1800_v58 }
 0x774   : > { %1799 = vmatmul.msk.bf16.vlgmr.msra.gmra.mxu0 %vm1279_vm14, %v1833_v23  ;;  %v1327_v31 = vpack.c.b16 %v1326_v30, %v1326_v30 }
 0x776   : > { %1810 = vmatmul.msk.bf16.vlgmr.msra.gmra.mxu1 %vm1279_vm14, %v1327_v31  ;;  %1304 = vperm.xlu0 %2000, %v2489_v5  }
 0x7e0   : > { %v1300_v4 = vpop.permute.xlu0 %1299 }
 0x7e8   : > { %v1305_v40 = vpop.permute.xlu0 %1304 }
 0x7f1   : > { %v1292_v32 = vpop.f32.mrf.mxu0 }
 0x7f2   : > { %v1293_v33 = vadd.f32 %v2001_v50, %v1292_v32 }
 0x7f3   : > { %v1352_v34 = vpop.f32.mrf.mxu1 }
 0x7f4   : > { %v1307_v35 = vmul.f32 %v1300_v4, %v1293_v33  ;;  %v1353_v36 = vadd.f32 %v2002_v51, %v1352_v34 }
 0x7f6   : > { %1310 = vst.msk [vmem:[#allocation13] sm:$0xff] %vm1309_vm15, %v1307_v35  ;;  %v1357_v37 = vrot.slane %v1353_v36, 1 }
 0x7f7   : > { %1360 = vst.msk [vmem:[#allocation15] sm:$0x1] %vm1359_vm0, %v1353_v36 }
 0x7f8   : > { %1361 = vst.msk [vmem:[#allocation15 + $0x1] sm:$0x1] %vm1359_vm0, %v1357_v37 }
 0x7f9   : > { %v1294_v5 = vpop.f32.mrf.mxu0 }
 0x7fa   : > { %v1295_v38 = vadd.f32 %v2001_v50, %v1294_v5 }
 0x7fb   : > { %v1354_v42 = vpop.f32.mrf.mxu1 }
 0x7fc   : > { %v1308_v43 = vmul.f32 %v1305_v40, %v1295_v38 }
 0x7fe   : > { %1311 = vst.msk [vmem:[#allocation13 + $0x8] sm:$0xff] %vm1309_vm15, %v1308_v43 }
 0x7ff PF: > { %s2919_s5 = sadd.s32 4294967295, %s2241_s23   ;;  %s2708_s1 = smul.u32 %s2225_s19, %s2229_s20 }
 0x800   : > { %s2704_s29 = sand.u32 1, %s2919_s5   ;;  %s1419_s3 = sshll.u32 %s2509_s21, 4  ;;  %s1420_s3 = int_to_ptr.vmem [resolvable:$true] %s1419_s3 }
 0x801   : > { %s2920_s14 = sld [smem:[#allocation41_spill]]  ;;  %s2251_s24 = smov [#allocation13]  }
 0x802   : > { %s1463_s0 = sshll.u32 %s2251_s24, 4  ;;  %s2867_s2 = scalar_lea.sflag [#allocation11], %s2704_s29  ;;  %s1464_s0 = int_to_ptr.vmem [resolvable:$true] %s1463_s0 }
 0x807   : > { %s1418_s6 = scalar_lea.hbm %s2920_s14, %s2708_s1  ;;  %s2023_s21 = scalar_lea.hbm %s2920_s14, 6 }
 0x808   : > { %s1421_s12 = sshll.u32 %s1418_s6, 4  ;;  %s1422_s12 = int_to_ptr.hbm [resolvable:$true] %s1421_s12 }
 0x809   : > { %s2017_s13 = sshra.s32 %s1422_s12, 4  ;;  %s2018_s13 = int_to_ptr.hbm [resolvable:$true] %s2017_s13 }
 0x80a   : > { %s2019_s25 = scalar_lea.hbm %s2018_s13, 2  ;;  %p2024_p7 = scmp.lt.s32.totalorder %s2018_s13, %s2920_s14 }
 0x80b   : > { %p2020_p2 = scmp.ne.s32.totalorder %s2018_s13, %s2019_s25  ;;  %p2025_p8 = scmp.lt.s32.totalorder %s2023_s21, %s2019_s25 }
 0x80d   : > { %p2021_p3 = pnand %p2020_p2, %p2457_p0  ;;  %p2026_p10 = por %p2025_p8, %p2024_p7 }
 0x80f   : > { %p2022_p5 = pneg %p2021_p3 }
 0x811   : > { %p2027_p11 = pnand %p2026_p10, %p2022_p5 }
 0x813   : > { %2030 = shalt.err (!%p2027_p11)
}
 0x814   : > { %s2868_s27 = smov 16   ;;  %s2253_s6 = smov 48  }
 0x815   : > { %s2254_s24 = smov 1   ;;  %s2921_s19 = sld [smem:[#allocation45_spill]] }
 0x816   : > { %1837 = dma.vmem_to_hbm [thread:$0]  (%p2457_p0), %s1420_s3, 32, %s1422_s12, %s2867_s2, %s2868_s27, %s2253_s6, %s2254_s24  }
 0x817   : > { %s2255_s5 = smov 128   ;;  %s2256_s16 = smov 8  }
 0x818   : > { %s2923_s17 = sld [smem:[#allocation40_spill]]  ;;  %s1400_s30 = sshll.u32 %s2507_s22, 4  ;;  %s1401_s30 = int_to_ptr.vmem [resolvable:$true] %s1400_s30 }
 0x819   : > { %s2925_s2 = sld [smem:[#allocation42_spill]]  ;;  %s1363_s25 = scalar_lea.sflag [#allocation9], %s2478_s8 }
 0x81b   : > { %s1465_s20 = sshll.u32 %s2921_s19, 4  ;;  %s1466_s20 = int_to_ptr.hbm [resolvable:$true] %s1465_s20 }
 0x81c   : > { %1840 = dma.vmem_to_hbm [thread:$0]  (%p2406_p4), %s1464_s0, 256, %s1466_s20, [#allocation14], %s2255_s5, %s2255_s5, %s2256_s16  }
 0x81e   : > { %s2924_s7 = smov %s2923_s17  ;;  %s1399_s15 = scalar_lea.hbm %s2923_s17, %s2500_s26 }
 0x81f   : > { %s1402_s11 = sshll.u32 %s1399_s15, 4  ;;  %s1437_s27 = scalar_lea.hbm %s2925_s2, %s2708_s1  ;;  %s1403_s11 = int_to_ptr.hbm [resolvable:$true] %s1402_s11 }
 0x820   : > { %s2073_s13 = sshra.s32 %s1403_s11, 4  ;;  %s2079_s17 = scalar_lea.hbm %s2924_s7, 6  ;;  %s2074_s13 = int_to_ptr.hbm [resolvable:$true] %s2073_s13 }
 0x821   : > { %s2075_s19 = scalar_lea.hbm %s2074_s13, 2  ;;  %p2080_p3 = scmp.lt.s32.totalorder %s2074_s13, %s2924_s7 }
 0x822   : > { %p2076_p12 = scmp.ne.s32.totalorder %s2074_s13, %s2075_s19  ;;  %p2081_p5 = scmp.lt.s32.totalorder %s2079_s17, %s2075_s19 }
 0x824   : > { %p2077_p13 = pnand %p2076_p12, %p2418_p6  ;;  %p2082_p7 = por %p2081_p5, %p2080_p3 }
 0x826   : > { %p2078_p2 = pneg %p2077_p13 }
 0x828   : > { %p2083_p8 = pnand %p2082_p7, %p2078_p2 }
 0x82a   : > { %2086 = shalt.err (!%p2083_p8)
}
 0x82b   : > { %s2926_s15 = smov 16   ;;  %s1438_s26 = sshll.u32 %s2511_s10, 4  ;;  %s1439_s26 = int_to_ptr.vmem [resolvable:$true] %s1438_s26 }
 0x82c   : > { %1836 = dma.vmem_to_hbm [thread:$0]  (%p2418_p6), %s1401_s30, 32, %s1403_s11, %s1363_s25, %s2926_s15, %s2253_s6, %s2254_s24  }
 0x82d   : > { %s1440_s8 = sshll.u32 %s1437_s27, 4  ;;  %s2107_s21 = scalar_lea.hbm %s2925_s2, 6  ;;  %s1441_s8 = int_to_ptr.hbm [resolvable:$true] %s1440_s8 }
 0x82e   : > { %s2101_s1 = sshra.s32 %s1441_s8, 4  ;;  %s2102_s1 = int_to_ptr.hbm [resolvable:$true] %s2101_s1 }
 0x82f   : > { %s2103_s14 = scalar_lea.hbm %s2102_s1, 2  ;;  %p2108_p13 = scmp.lt.s32.totalorder %s2102_s1, %s2925_s2 }
 0x830   : > { %p2104_p10 = scmp.ne.s32.totalorder %s2102_s1, %s2103_s14  ;;  %p2109_p6 = scmp.lt.s32.totalorder %s2107_s21, %s2103_s14 }
 0x832   : > { %p2105_p11 = pnand %p2104_p10, %p2457_p0  ;;  %p2110_p2 = por %p2109_p6, %p2108_p13 }
 0x834   : > { %p2106_p12 = pneg %p2105_p11 }
 0x836   : > { %p2111_p3 = pnand %p2110_p2, %p2106_p12 }
 0x838   : > { %2114 = shalt.err (!%p2111_p3)
}
 0x839   : > { %s2927_s30 = scalar_lea.sflag [#allocation11], %s2704_s29  ;;  %s2928_s27 = sld [smem:[#allocation46_spill]] }
 0x83a   : > { %1838 = dma.vmem_to_hbm [thread:$0]  (%p2457_p0), %s1439_s26, 32, %s1441_s8, %s2927_s30, %s2926_s15, %s2253_s6, %s2254_s24  }
 0x83b   : > { %s2257_s13 = smov [#allocation15]  }
 0x83c   : > { %s1479_s19 = sshll.u32 %s2257_s13, 4  ;;  %s1480_s19 = int_to_ptr.vmem [resolvable:$true] %s1479_s19 }
 0x83f   : > { %s1481_s25 = sshll.u32 %s2928_s27, 4  ;;  %s1482_s25 = int_to_ptr.hbm [resolvable:$true] %s1481_s25 }
 0x840   : > { %1842 = dma.vmem_to_hbm [thread:$0]  (%p2406_p4), %s1480_s19, 32, %s1482_s25, [#allocation14], %s2926_s15, %s2926_s15, %s2254_s24  }
 0x841   : > { %2188 = dma.done.wait (%p2406_p4), [#allocation14], 288  }
 0x842   : > { %2190 = vsyncadd (%p2406_p4), [#allocation14], 4294967008 }
 0x843 PF: > { %s2929_s9 = sld [smem:[#allocation21_spill]]  ;;  %p1864_p0 = scmp.ge.s32.totalorder %s2241_s23, 2 }
 0x845   : > { %p1851_p5 = pnand %p1864_p0, %p2440_p9 }
 0x847   : > { %p1852_p7 = pneg %p1851_p5 }
 0x849   : > { %s1522_s29 = sand.u32 1, %s2929_s9  }
 0x84a   : > { %s1523_s6 = scalar_lea.sflag [#allocation9], %s1522_s29 }
 0x84b   : > { %2192 = dma.done.wait (%p1852_p7), %s1523_s6, 32  }
 0x84c   : > { %2194 = vsyncadd (%p1852_p7), %s1523_s6, 4294967264  ;;  %s2930_s0 = sadd.s32 4294967294, %s2241_s23   ;;  %p1854_p8 = pnand %p1864_p0, %p2463_p1 }
 0x84d   : > { %s1532_s20 = sand.u32 1, %s2930_s0  }
 0x84e   : > { %p1855_p10 = pneg %p1854_p8  ;;  %s1533_s28 = scalar_lea.sflag [#allocation11], %s1532_s20 }
 0x850   : > { %2196 = dma.done.wait (%p1855_p10), %s1533_s28, 64  }
 0x851   : > { %2198 = vsyncadd (%p1855_p10), %s1533_s28, 4294967232  ;;  %s32_s23 = sadd.s32 1, %s2241_s23   ;;  %s2932_s29 = sld [smem:[#allocation19_spill]] }
 0x852   : > { %p29_p4 = scmp.ge.s32.totalorder %s32_s23, 8   ;;  %s2933_s30 = sld [smem:[#allocation20_spill]] }
 0x853   : > { %s2934_s15 = sld [smem:[#allocation30_spill]] }
 0x854   : > { %s2935_s16 = sld [smem:[#allocation22_spill]] }
 0x855   : > { %s2936_s17 = sld [smem:[#allocation23_spill]] }
 0x856   : > { %s2937_s18 = sld [smem:[#allocation29_spill]]  ;;  %31 = sbr.rel (!%p29_p4) target bundleno = 26 (0x1a), region = 238 }
 0x857   : > { %s2938_s19 = sld [smem:[#allocation24_spill]] }
 0x858   : > { %s2939_s20 = sld [smem:[#allocation25_spill]] }
 0x859   : > { %s2940_s21 = sld [smem:[#allocation26_spill]] }
 0x85a   : > { %s2941_s22 = sld [smem:[#allocation27_spill]] }
 0x85b   :  { %1549 = vsyncpa [#allocation9], 1 }
 0x85c   :  { %1551 = vsyncpa [#allocation9 + $0x1], 1 }
 0x85d   :  { %1552 = vsyncpa [#allocation11], 1 }
 0x85e   :  { %1554 = vsyncpa [#allocation11 + $0x1], 1 }
 0x85f   :  { %1555 = vsyncpa [#allocation14], 1 }

</bundles_post_ra>
